<compile_context>
chip_gen: v5e
topology: v5e:2x2
jax: 0.10.0
libtpu: 0.0.40
codegen_flags: <defaults>
</compile_context>

<pallas_src>
from functools import partial

import jax
import jax.numpy as jnp
from jax import lax
from jax.experimental import pallas as pl
from jax.experimental.pallas import tpu as pltpu

LRELU_SLOPE = 0.2
PAD = 3  # max dilation -> single shared spatial padding


def _shift_lanes(v, s, L):
    """y[:, p] = v[:, (p + s) % L]  (circular shift along the lane axis).

    Wrap-around values only ever land in the padded region of the flattened
    image, which is discarded by the wrapper, so circular semantics are safe.
    """
    k = s % L
    if k == 0:
        return v
    return jnp.concatenate([v[:, k:], v[:, :k]], axis=1)


def _msdc_kernel(x_ref, w1_ref, w2_ref, w3_ref, b_ref, wf_ref, bf_ref, o_ref,
                 *, Wp, Lpad):
    # x_ref: (1, Cin, Lpad) bf16 -- zero-padded image, H*W flattened on lanes.
    x = x_ref[0]

    def dilated_conv_pre(w_ref, d):
        # im2col: the 9 taps of a dilation-d 3x3 conv are constant lane shifts
        # of the flattened padded image (shift = dy*Wp + dx).
        taps = []
        for ky in (-1, 0, 1):
            for kx in (-1, 0, 1):
                taps.append(_shift_lanes(x, ky * d * Wp + kx * d, Lpad))
        patches = jnp.concatenate(taps, axis=0)                # (9*Cin, Lpad) bf16
        # single MXU push per dilated conv, f32 accumulation.
        return jnp.dot(w_ref[...], patches,
                       preferred_element_type=jnp.float32)     # (Cout, Lpad) f32

    # stack the three pre-activations channel-first, add biases, LeakyReLU(0.2)
    z = jnp.concatenate([dilated_conv_pre(w1_ref, 1),
                         dilated_conv_pre(w2_ref, 2),
                         dilated_conv_pre(w3_ref, 3)], axis=0)  # (3*Cout, Lpad)
    z = z + b_ref[...]                                          # (3*Cout, 1) f32
    a = jnp.where(z >= 0, z, LRELU_SLOPE * z)                   # f32 elementwise

    # single 1x1 fusion matmul over the concatenated channels.
    out = jnp.dot(wf_ref[...], a.astype(jnp.bfloat16),
                  preferred_element_type=jnp.float32) + bf_ref[...]
    o_ref[0] = out                                              # (Cout, Lpad) f32


def msdc_forward(x_nchw, params):
    """params = (w1, w2, w3, b1, b2, b3, wf, bf) in PyTorch Conv2d layouts."""
    w1, w2, w3, b1, b2, b3, wf, bf = params
    N, Cin, H, W = x_nchw.shape
    Cout = wf.shape[0]
    Hp, Wp = H + 2 * PAD, W + 2 * PAD
    Lpad = ((Hp * Wp + 127) // 128) * 128      # lane-pad flattened spatial dim

    # ---- trace-time operand prep (keeps all relayouts out of the kernel) ----
    # NCHW is already channel-first: pad spatially, flatten H*W onto lanes,
    # pad to a multiple of 128 lanes, cast to bf16.
    xp = jnp.pad(x_nchw.astype(jnp.bfloat16),
                 ((0, 0), (0, 0), (PAD, PAD), (PAD, PAD)))
    x_flat = jnp.pad(xp.reshape(N, Cin, Hp * Wp),
                     ((0, 0), (0, 0), (0, Lpad - Hp * Wp)))

    # conv weights (Cout, Cin, 3, 3) -> im2col layout (Cout, 9*Cin); tap order
    # (ky, kx) matches the kernel's patch stacking.
    def im2col_w(w):
        return jnp.transpose(w, (0, 2, 3, 1)).reshape(Cout, 9 * Cin).astype(
            jnp.bfloat16)

    w1m, w2m, w3m = im2col_w(w1), im2col_w(w2), im2col_w(w3)
    b_all = jnp.concatenate([b1, b2, b3]).reshape(3 * Cout, 1).astype(jnp.float32)
    wf_mat = wf.reshape(Cout, 3 * Cout).astype(jnp.bfloat16)
    bf_col = bf.reshape(Cout, 1).astype(jnp.float32)

    kernel = partial(_msdc_kernel, Wp=Wp, Lpad=Lpad)

    out_flat = pl.pallas_call(
        kernel,
        out_shape=jax.ShapeDtypeStruct((N, Cout, Lpad), jnp.float32),
        grid=(N,),
        in_specs=[
            pl.BlockSpec((1, Cin, Lpad), lambda n: (n, 0, 0)),
            pl.BlockSpec((Cout, 9 * Cin), lambda n: (0, 0)),
            pl.BlockSpec((Cout, 9 * Cin), lambda n: (0, 0)),
            pl.BlockSpec((Cout, 9 * Cin), lambda n: (0, 0)),
            pl.BlockSpec((3 * Cout, 1), lambda n: (0, 0)),
            pl.BlockSpec((Cout, 3 * Cout), lambda n: (0, 0)),
            pl.BlockSpec((Cout, 1), lambda n: (0, 0)),
        ],
        out_specs=pl.BlockSpec((1, Cout, Lpad), lambda n: (n, 0, 0)),
        compiler_params=pltpu.CompilerParams(
            dimension_semantics=("parallel",)),
    )(x_flat, w1m, w2m, w3m, b_all, wf_mat, bf_col)

    # channel-first output already: just crop the lane padding and the spatial
    # halo.  No NCHW transpose needed.
    out = out_flat[:, :, :Hp * Wp].reshape(N, Cout, Hp, Wp)
    return out[:, :, PAD:PAD + H, PAD:PAD + W]


def msdc_reference(x_nchw, params):
    """Pure-JAX NCHW reference mirroring the kernel's bf16 quantization."""
    w1, w2, w3, b1, b2, b3, wf, bf = params
    q = lambda t: t.astype(jnp.bfloat16).astype(jnp.float32)
    x = q(x_nchw)

    def dconv(w, b, d):
        y = lax.conv_general_dilated(
            x, q(w), window_strides=(1, 1), padding=((d, d), (d, d)),
            rhs_dilation=(d, d), dimension_numbers=('NCHW', 'OIHW', 'NCHW'),
            precision=lax.Precision.HIGHEST)
        y = y + b[None, :, None, None]
        return jnp.where(y >= 0, y, LRELU_SLOPE * y)

    cat = jnp.concatenate(
        [dconv(w1, b1, 1), dconv(w2, b2, 2), dconv(w3, b3, 3)], axis=1)
    cat = q(cat)   # kernel feeds bf16 activations to the fusion matmul
    out = lax.conv_general_dilated(
        cat, q(wf), window_strides=(1, 1), padding=((0, 0), (0, 0)),
        dimension_numbers=('NCHW', 'OIHW', 'NCHW'),
        precision=lax.Precision.HIGHEST)
    return out + bf[None, :, None, None]


def init_params(key, in_planes, planes):
    ks = jax.random.split(key, 8)
    s3 = 1.0 / jnp.sqrt(9.0 * in_planes)
    s1 = 1.0 / jnp.sqrt(3.0 * planes)
    w1 = jax.random.normal(ks[0], (planes, in_planes, 3, 3), jnp.float32) * s3
    w2 = jax.random.normal(ks[1], (planes, in_planes, 3, 3), jnp.float32) * s3
    w3 = jax.random.normal(ks[2], (planes, in_planes, 3, 3), jnp.float32) * s3
    b1 = jax.random.normal(ks[3], (planes,), jnp.float32) * s3
    b2 = jax.random.normal(ks[4], (planes,), jnp.float32) * s3
    b3 = jax.random.normal(ks[5], (planes,), jnp.float32) * s3
    wf = jax.random.normal(ks[6], (planes, 3 * planes, 1, 1), jnp.float32) * s1
    bf = jax.random.normal(ks[7], (planes,), jnp.float32) * s1
    return (w1, w2, w3, b1, b2, b3, wf, bf)


if __name__ == "__main__":
    N, Cin, H, W = 2, 4, 16, 16
    planes = 8

    key = jax.random.PRNGKey(0)
    kx, kp = jax.random.split(key)
    x = jax.random.normal(kx, (N, Cin, H, W), jnp.float32)
    params = init_params(kp, Cin, planes)

    out = jax.block_until_ready(msdc_forward(x, params))
    ref = msdc_reference(x, params)

    assert out.shape == (N, planes, H, W)
    err = jnp.max(jnp.abs(out - ref))
    # bf16 operands on both sides, f32 accumulation; tolerance covers
    # accumulation-order differences and rare bf16 rounding ties.
    assert jnp.allclose(out, ref, atol=1e-2, rtol=1e-2), f"max abs diff {err}"

    print("KERNEL_OK")
</pallas_src>

<mosaic_0001>
module attributes {stable_mosaic.version = 11 : i64} {
  func.func @_msdc_kernel(%arg0: i32, %arg1: memref<1x4x512xbf16, #tpu.memory_space<vmem>>, %arg2: memref<8x36xbf16, #tpu.memory_space<vmem>>, %arg3: memref<8x36xbf16, #tpu.memory_space<vmem>>, %arg4: memref<8x36xbf16, #tpu.memory_space<vmem>>, %arg5: memref<24x1xf32, #tpu.memory_space<vmem>>, %arg6: memref<8x24xbf16, #tpu.memory_space<vmem>>, %arg7: memref<8x1xf32, #tpu.memory_space<vmem>>, %arg8: memref<1x8x512xf32, #tpu.memory_space<vmem>>) attributes {dimension_semantics = [#tpu.dimension_semantics<parallel>], iteration_bounds = array<i64: 2>, scalar_prefetch = 0 : i64, scratch_operands = 0 : i64, tpu.core_type = #tpu.core_type<tc>, window_params = [{transform_indices = @transform_0, window_bounds = array<i64: 1, 4, 512>}, {pipeline_mode = #tpu.pipeline_mode<synchronous>, transform_indices = @transform_1, window_bounds = array<i64: 8, 36>}, {pipeline_mode = #tpu.pipeline_mode<synchronous>, transform_indices = @transform_2, window_bounds = array<i64: 8, 36>}, {pipeline_mode = #tpu.pipeline_mode<synchronous>, transform_indices = @transform_3, window_bounds = array<i64: 8, 36>}, {pipeline_mode = #tpu.pipeline_mode<synchronous>, transform_indices = @transform_4, window_bounds = array<i64: 24, 1>}, {pipeline_mode = #tpu.pipeline_mode<synchronous>, transform_indices = @transform_5, window_bounds = array<i64: 8, 24>}, {pipeline_mode = #tpu.pipeline_mode<synchronous>, transform_indices = @transform_6, window_bounds = array<i64: 8, 1>}, {transform_indices = @transform_7, window_bounds = array<i64: 1, 8, 512>}]} {
    %c0 = arith.constant 0 : index
    %c0_0 = arith.constant 0 : index
    %c0_1 = arith.constant 0 : index
    %0 = vector.load %arg1[%c0, %c0_0, %c0_1] : memref<1x4x512xbf16, #tpu.memory_space<vmem>>, vector<1x4x512xbf16>
    %1 = vector.shape_cast %0 : vector<1x4x512xbf16> to vector<4x512xbf16>
    %2 = vector.extract_strided_slice %1 {offsets = [0, 489], sizes = [4, 23], strides = [1, 1]} : vector<4x512xbf16> to vector<4x23xbf16>
    %3 = vector.extract_strided_slice %1 {offsets = [0, 0], sizes = [4, 489], strides = [1, 1]} : vector<4x512xbf16> to vector<4x489xbf16>
    %4 = tpu.concatenate %2, %3 in 1 : vector<4x23xbf16>, vector<4x489xbf16> -> vector<4x512xbf16>
    %5 = vector.extract_strided_slice %1 {offsets = [0, 490], sizes = [4, 22], strides = [1, 1]} : vector<4x512xbf16> to vector<4x22xbf16>
    %6 = vector.extract_strided_slice %1 {offsets = [0, 0], sizes = [4, 490], strides = [1, 1]} : vector<4x512xbf16> to vector<4x490xbf16>
    %7 = tpu.concatenate %5, %6 in 1 : vector<4x22xbf16>, vector<4x490xbf16> -> vector<4x512xbf16>
    %8 = vector.extract_strided_slice %1 {offsets = [0, 491], sizes = [4, 21], strides = [1, 1]} : vector<4x512xbf16> to vector<4x21xbf16>
    %9 = vector.extract_strided_slice %1 {offsets = [0, 0], sizes = [4, 491], strides = [1, 1]} : vector<4x512xbf16> to vector<4x491xbf16>
    %10 = tpu.concatenate %8, %9 in 1 : vector<4x21xbf16>, vector<4x491xbf16> -> vector<4x512xbf16>
    %11 = vector.extract_strided_slice %1 {offsets = [0, 511], sizes = [4, 1], strides = [1, 1]} : vector<4x512xbf16> to vector<4x1xbf16>
    %12 = vector.extract_strided_slice %1 {offsets = [0, 0], sizes = [4, 511], strides = [1, 1]} : vector<4x512xbf16> to vector<4x511xbf16>
    %13 = tpu.concatenate %11, %12 in 1 : vector<4x1xbf16>, vector<4x511xbf16> -> vector<4x512xbf16>
    %14 = vector.extract_strided_slice %1 {offsets = [0, 1], sizes = [4, 511], strides = [1, 1]} : vector<4x512xbf16> to vector<4x511xbf16>
    %15 = vector.extract_strided_slice %1 {offsets = [0, 0], sizes = [4, 1], strides = [1, 1]} : vector<4x512xbf16> to vector<4x1xbf16>
    %16 = tpu.concatenate %14, %15 in 1 : vector<4x511xbf16>, vector<4x1xbf16> -> vector<4x512xbf16>
    %17 = vector.extract_strided_slice %1 {offsets = [0, 21], sizes = [4, 491], strides = [1, 1]} : vector<4x512xbf16> to vector<4x491xbf16>
    %18 = vector.extract_strided_slice %1 {offsets = [0, 0], sizes = [4, 21], strides = [1, 1]} : vector<4x512xbf16> to vector<4x21xbf16>
    %19 = tpu.concatenate %17, %18 in 1 : vector<4x491xbf16>, vector<4x21xbf16> -> vector<4x512xbf16>
    %20 = vector.extract_strided_slice %1 {offsets = [0, 22], sizes = [4, 490], strides = [1, 1]} : vector<4x512xbf16> to vector<4x490xbf16>
    %21 = vector.extract_strided_slice %1 {offsets = [0, 0], sizes = [4, 22], strides = [1, 1]} : vector<4x512xbf16> to vector<4x22xbf16>
    %22 = tpu.concatenate %20, %21 in 1 : vector<4x490xbf16>, vector<4x22xbf16> -> vector<4x512xbf16>
    %23 = vector.extract_strided_slice %1 {offsets = [0, 23], sizes = [4, 489], strides = [1, 1]} : vector<4x512xbf16> to vector<4x489xbf16>
    %24 = vector.extract_strided_slice %1 {offsets = [0, 0], sizes = [4, 23], strides = [1, 1]} : vector<4x512xbf16> to vector<4x23xbf16>
    %25 = tpu.concatenate %23, %24 in 1 : vector<4x489xbf16>, vector<4x23xbf16> -> vector<4x512xbf16>
    %26 = tpu.concatenate %4, %7, %10, %13, %1, %16, %19, %22, %25 in 0 : vector<4x512xbf16>, vector<4x512xbf16>, vector<4x512xbf16>, vector<4x512xbf16>, vector<4x512xbf16>, vector<4x512xbf16>, vector<4x512xbf16>, vector<4x512xbf16>, vector<4x512xbf16> -> vector<36x512xbf16>
    %c0_2 = arith.constant 0 : index
    %c0_3 = arith.constant 0 : index
    %27 = vector.load %arg2[%c0_2, %c0_3] : memref<8x36xbf16, #tpu.memory_space<vmem>>, vector<8x36xbf16>
    %cst = arith.constant dense<0.000000e+00> : vector<8x512xf32>
    %28 = tpu.matmul %27, %26, %cst {dimension_numbers = #tpu.dot_dimension_numbers<[1], [0], [0], [1], [0, 0, 1, 1], [], []>} : vector<8x36xbf16>, vector<36x512xbf16>, vector<8x512xf32> -> vector<8x512xf32>
    %29 = vector.extract_strided_slice %1 {offsets = [0, 466], sizes = [4, 46], strides = [1, 1]} : vector<4x512xbf16> to vector<4x46xbf16>
    %30 = vector.extract_strided_slice %1 {offsets = [0, 0], sizes = [4, 466], strides = [1, 1]} : vector<4x512xbf16> to vector<4x466xbf16>
    %31 = tpu.concatenate %29, %30 in 1 : vector<4x46xbf16>, vector<4x466xbf16> -> vector<4x512xbf16>
    %32 = vector.extract_strided_slice %1 {offsets = [0, 468], sizes = [4, 44], strides = [1, 1]} : vector<4x512xbf16> to vector<4x44xbf16>
    %33 = vector.extract_strided_slice %1 {offsets = [0, 0], sizes = [4, 468], strides = [1, 1]} : vector<4x512xbf16> to vector<4x468xbf16>
    %34 = tpu.concatenate %32, %33 in 1 : vector<4x44xbf16>, vector<4x468xbf16> -> vector<4x512xbf16>
    %35 = vector.extract_strided_slice %1 {offsets = [0, 470], sizes = [4, 42], strides = [1, 1]} : vector<4x512xbf16> to vector<4x42xbf16>
    %36 = vector.extract_strided_slice %1 {offsets = [0, 0], sizes = [4, 470], strides = [1, 1]} : vector<4x512xbf16> to vector<4x470xbf16>
    %37 = tpu.concatenate %35, %36 in 1 : vector<4x42xbf16>, vector<4x470xbf16> -> vector<4x512xbf16>
    %38 = vector.extract_strided_slice %1 {offsets = [0, 510], sizes = [4, 2], strides = [1, 1]} : vector<4x512xbf16> to vector<4x2xbf16>
    %39 = vector.extract_strided_slice %1 {offsets = [0, 0], sizes = [4, 510], strides = [1, 1]} : vector<4x512xbf16> to vector<4x510xbf16>
    %40 = tpu.concatenate %38, %39 in 1 : vector<4x2xbf16>, vector<4x510xbf16> -> vector<4x512xbf16>
    %41 = vector.extract_strided_slice %1 {offsets = [0, 2], sizes = [4, 510], strides = [1, 1]} : vector<4x512xbf16> to vector<4x510xbf16>
    %42 = vector.extract_strided_slice %1 {offsets = [0, 0], sizes = [4, 2], strides = [1, 1]} : vector<4x512xbf16> to vector<4x2xbf16>
    %43 = tpu.concatenate %41, %42 in 1 : vector<4x510xbf16>, vector<4x2xbf16> -> vector<4x512xbf16>
    %44 = vector.extract_strided_slice %1 {offsets = [0, 42], sizes = [4, 470], strides = [1, 1]} : vector<4x512xbf16> to vector<4x470xbf16>
    %45 = vector.extract_strided_slice %1 {offsets = [0, 0], sizes = [4, 42], strides = [1, 1]} : vector<4x512xbf16> to vector<4x42xbf16>
    %46 = tpu.concatenate %44, %45 in 1 : vector<4x470xbf16>, vector<4x42xbf16> -> vector<4x512xbf16>
    %47 = vector.extract_strided_slice %1 {offsets = [0, 44], sizes = [4, 468], strides = [1, 1]} : vector<4x512xbf16> to vector<4x468xbf16>
    %48 = vector.extract_strided_slice %1 {offsets = [0, 0], sizes = [4, 44], strides = [1, 1]} : vector<4x512xbf16> to vector<4x44xbf16>
    %49 = tpu.concatenate %47, %48 in 1 : vector<4x468xbf16>, vector<4x44xbf16> -> vector<4x512xbf16>
    %50 = vector.extract_strided_slice %1 {offsets = [0, 46], sizes = [4, 466], strides = [1, 1]} : vector<4x512xbf16> to vector<4x466xbf16>
    %51 = vector.extract_strided_slice %1 {offsets = [0, 0], sizes = [4, 46], strides = [1, 1]} : vector<4x512xbf16> to vector<4x46xbf16>
    %52 = tpu.concatenate %50, %51 in 1 : vector<4x466xbf16>, vector<4x46xbf16> -> vector<4x512xbf16>
    %53 = tpu.concatenate %31, %34, %37, %40, %1, %43, %46, %49, %52 in 0 : vector<4x512xbf16>, vector<4x512xbf16>, vector<4x512xbf16>, vector<4x512xbf16>, vector<4x512xbf16>, vector<4x512xbf16>, vector<4x512xbf16>, vector<4x512xbf16>, vector<4x512xbf16> -> vector<36x512xbf16>
    %c0_4 = arith.constant 0 : index
    %c0_5 = arith.constant 0 : index
    %54 = vector.load %arg3[%c0_4, %c0_5] : memref<8x36xbf16, #tpu.memory_space<vmem>>, vector<8x36xbf16>
    %cst_6 = arith.constant dense<0.000000e+00> : vector<8x512xf32>
    %55 = tpu.matmul %54, %53, %cst_6 {dimension_numbers = #tpu.dot_dimension_numbers<[1], [0], [0], [1], [0, 0, 1, 1], [], []>} : vector<8x36xbf16>, vector<36x512xbf16>, vector<8x512xf32> -> vector<8x512xf32>
    %56 = vector.extract_strided_slice %1 {offsets = [0, 443], sizes = [4, 69], strides = [1, 1]} : vector<4x512xbf16> to vector<4x69xbf16>
    %57 = vector.extract_strided_slice %1 {offsets = [0, 0], sizes = [4, 443], strides = [1, 1]} : vector<4x512xbf16> to vector<4x443xbf16>
    %58 = tpu.concatenate %56, %57 in 1 : vector<4x69xbf16>, vector<4x443xbf16> -> vector<4x512xbf16>
    %59 = vector.extract_strided_slice %1 {offsets = [0, 446], sizes = [4, 66], strides = [1, 1]} : vector<4x512xbf16> to vector<4x66xbf16>
    %60 = vector.extract_strided_slice %1 {offsets = [0, 0], sizes = [4, 446], strides = [1, 1]} : vector<4x512xbf16> to vector<4x446xbf16>
    %61 = tpu.concatenate %59, %60 in 1 : vector<4x66xbf16>, vector<4x446xbf16> -> vector<4x512xbf16>
    %62 = vector.extract_strided_slice %1 {offsets = [0, 449], sizes = [4, 63], strides = [1, 1]} : vector<4x512xbf16> to vector<4x63xbf16>
    %63 = vector.extract_strided_slice %1 {offsets = [0, 0], sizes = [4, 449], strides = [1, 1]} : vector<4x512xbf16> to vector<4x449xbf16>
    %64 = tpu.concatenate %62, %63 in 1 : vector<4x63xbf16>, vector<4x449xbf16> -> vector<4x512xbf16>
    %65 = vector.extract_strided_slice %1 {offsets = [0, 509], sizes = [4, 3], strides = [1, 1]} : vector<4x512xbf16> to vector<4x3xbf16>
    %66 = vector.extract_strided_slice %1 {offsets = [0, 0], sizes = [4, 509], strides = [1, 1]} : vector<4x512xbf16> to vector<4x509xbf16>
    %67 = tpu.concatenate %65, %66 in 1 : vector<4x3xbf16>, vector<4x509xbf16> -> vector<4x512xbf16>
    %68 = vector.extract_strided_slice %1 {offsets = [0, 3], sizes = [4, 509], strides = [1, 1]} : vector<4x512xbf16> to vector<4x509xbf16>
    %69 = vector.extract_strided_slice %1 {offsets = [0, 0], sizes = [4, 3], strides = [1, 1]} : vector<4x512xbf16> to vector<4x3xbf16>
    %70 = tpu.concatenate %68, %69 in 1 : vector<4x509xbf16>, vector<4x3xbf16> -> vector<4x512xbf16>
    %71 = vector.extract_strided_slice %1 {offsets = [0, 63], sizes = [4, 449], strides = [1, 1]} : vector<4x512xbf16> to vector<4x449xbf16>
    %72 = vector.extract_strided_slice %1 {offsets = [0, 0], sizes = [4, 63], strides = [1, 1]} : vector<4x512xbf16> to vector<4x63xbf16>
    %73 = tpu.concatenate %71, %72 in 1 : vector<4x449xbf16>, vector<4x63xbf16> -> vector<4x512xbf16>
    %74 = vector.extract_strided_slice %1 {offsets = [0, 66], sizes = [4, 446], strides = [1, 1]} : vector<4x512xbf16> to vector<4x446xbf16>
    %75 = vector.extract_strided_slice %1 {offsets = [0, 0], sizes = [4, 66], strides = [1, 1]} : vector<4x512xbf16> to vector<4x66xbf16>
    %76 = tpu.concatenate %74, %75 in 1 : vector<4x446xbf16>, vector<4x66xbf16> -> vector<4x512xbf16>
    %77 = vector.extract_strided_slice %1 {offsets = [0, 69], sizes = [4, 443], strides = [1, 1]} : vector<4x512xbf16> to vector<4x443xbf16>
    %78 = vector.extract_strided_slice %1 {offsets = [0, 0], sizes = [4, 69], strides = [1, 1]} : vector<4x512xbf16> to vector<4x69xbf16>
    %79 = tpu.concatenate %77, %78 in 1 : vector<4x443xbf16>, vector<4x69xbf16> -> vector<4x512xbf16>
    %80 = tpu.concatenate %58, %61, %64, %67, %1, %70, %73, %76, %79 in 0 : vector<4x512xbf16>, vector<4x512xbf16>, vector<4x512xbf16>, vector<4x512xbf16>, vector<4x512xbf16>, vector<4x512xbf16>, vector<4x512xbf16>, vector<4x512xbf16>, vector<4x512xbf16> -> vector<36x512xbf16>
    %c0_7 = arith.constant 0 : index
    %c0_8 = arith.constant 0 : index
    %81 = vector.load %arg4[%c0_7, %c0_8] : memref<8x36xbf16, #tpu.memory_space<vmem>>, vector<8x36xbf16>
    %cst_9 = arith.constant dense<0.000000e+00> : vector<8x512xf32>
    %82 = tpu.matmul %81, %80, %cst_9 {dimension_numbers = #tpu.dot_dimension_numbers<[1], [0], [0], [1], [0, 0, 1, 1], [], []>} : vector<8x36xbf16>, vector<36x512xbf16>, vector<8x512xf32> -> vector<8x512xf32>
    %83 = tpu.concatenate %28, %55, %82 in 0 : vector<8x512xf32>, vector<8x512xf32>, vector<8x512xf32> -> vector<24x512xf32>
    %c0_10 = arith.constant 0 : index
    %c0_11 = arith.constant 0 : index
    %84 = vector.load %arg5[%c0_10, %c0_11] : memref<24x1xf32, #tpu.memory_space<vmem>>, vector<24x1xf32>
    %85 = vector.broadcast %84 : vector<24x1xf32> to vector<24x512xf32>
    %86 = arith.addf %83, %85 : vector<24x512xf32>
    %cst_12 = arith.constant 0.000000e+00 : f32
    %87 = vector.broadcast %cst_12 : f32 to vector<24x512xf32>
    %88 = arith.cmpf oge, %86, %87 : vector<24x512xf32>
    %cst_13 = arith.constant 2.000000e-01 : f32
    %89 = vector.broadcast %cst_13 : f32 to vector<24x512xf32>
    %90 = arith.mulf %89, %86 : vector<24x512xf32>
    %91 = arith.select %88, %86, %90 : vector<24x512xi1>, vector<24x512xf32>
    %c0_14 = arith.constant 0 : index
    %c0_15 = arith.constant 0 : index
    %92 = vector.load %arg6[%c0_14, %c0_15] : memref<8x24xbf16, #tpu.memory_space<vmem>>, vector<8x24xbf16>
    %93 = arith.truncf %91 : vector<24x512xf32> to vector<24x512xbf16>
    %cst_16 = arith.constant dense<0.000000e+00> : vector<8x512xf32>
    %94 = tpu.matmul %92, %93, %cst_16 {dimension_numbers = #tpu.dot_dimension_numbers<[1], [0], [0], [1], [0, 0, 1, 1], [], []>} : vector<8x24xbf16>, vector<24x512xbf16>, vector<8x512xf32> -> vector<8x512xf32>
    %c0_17 = arith.constant 0 : index
    %c0_18 = arith.constant 0 : index
    %95 = vector.load %arg7[%c0_17, %c0_18] : memref<8x1xf32, #tpu.memory_space<vmem>>, vector<8x1xf32>
    %96 = vector.broadcast %95 : vector<8x1xf32> to vector<8x512xf32>
    %97 = arith.addf %94, %96 : vector<8x512xf32>
    %c0_19 = arith.constant 0 : index
    %c0_20 = arith.constant 0 : index
    %c0_21 = arith.constant 0 : index
    %98 = vector.load %arg8[%c0_19, %c0_20, %c0_21] : memref<1x8x512xf32, #tpu.memory_space<vmem>>, vector<1x8x512xf32>
    %99 = vector.shape_cast %98 : vector<1x8x512xf32> to vector<8x512xf32>
    %100 = vector.shape_cast %97 : vector<8x512xf32> to vector<1x8x512xf32>
    tpu.vector_store %arg8[%c0_19, %c0_20, %c0_21], %100 {strides = array<i32>} : memref<1x8x512xf32, #tpu.memory_space<vmem>>, vector<1x8x512xf32>,
    return
  }
  func.func @transform_0(%arg0: i32) -> (i32, i32, i32) {
    %c0_i32 = arith.constant 0 : i32
    %c0_i32_0 = arith.constant 0 : i32
    %c0_i32_1 = arith.constant 0 : i32
    return %arg0, %c0_i32, %c0_i32_0 : i32, i32, i32
  }
  func.func @transform_1(%arg0: i32) -> (i32, i32) {
    %c0_i32 = arith.constant 0 : i32
    %c0_i32_0 = arith.constant 0 : i32
    %c0_i32_1 = arith.constant 0 : i32
    return %c0_i32, %c0_i32_0 : i32, i32
  }
  func.func @transform_2(%arg0: i32) -> (i32, i32) {
    %c0_i32 = arith.constant 0 : i32
    %c0_i32_0 = arith.constant 0 : i32
    %c0_i32_1 = arith.constant 0 : i32
    return %c0_i32, %c0_i32_0 : i32, i32
  }
  func.func @transform_3(%arg0: i32) -> (i32, i32) {
    %c0_i32 = arith.constant 0 : i32
    %c0_i32_0 = arith.constant 0 : i32
    %c0_i32_1 = arith.constant 0 : i32
    return %c0_i32, %c0_i32_0 : i32, i32
  }
  func.func @transform_4(%arg0: i32) -> (i32, i32) {
    %c0_i32 = arith.constant 0 : i32
    %c0_i32_0 = arith.constant 0 : i32
    %c0_i32_1 = arith.constant 0 : i32
    return %c0_i32, %c0_i32_0 : i32, i32
  }
  func.func @transform_5(%arg0: i32) -> (i32, i32) {
    %c0_i32 = arith.constant 0 : i32
    %c0_i32_0 = arith.constant 0 : i32
    %c0_i32_1 = arith.constant 0 : i32
    return %c0_i32, %c0_i32_0 : i32, i32
  }
  func.func @transform_6(%arg0: i32) -> (i32, i32) {
    %c0_i32 = arith.constant 0 : i32
    %c0_i32_0 = arith.constant 0 : i32
    %c0_i32_1 = arith.constant 0 : i32
    return %c0_i32, %c0_i32_0 : i32, i32
  }
  func.func @transform_7(%arg0: i32) -> (i32, i32, i32) {
    %c0_i32 = arith.constant 0 : i32
    %c0_i32_0 = arith.constant 0 : i32
    %c0_i32_1 = arith.constant 0 : i32
    return %arg0, %c0_i32, %c0_i32_0 : i32, i32, i32
  }
}

</mosaic_0001>

<bundles_post_ra>
// kernel: tpu_custom_call.1
= control target key start
LH: loop header
LB: loop body
LE: loop exit
PB: predicated region body
PF: predicated region fallthrough
CT: control target
= control target key end

     0   :  { %12 = vsyncpa [#allocation3], 0  ;;  %s2564_s0 = inlined_call_operand.vmem [shape: bf16[2,4,512], index: 0, kind: input, shape index: {}]   ;;  %s2565_s1 = inlined_call_operand.vmem [shape: bf16[8,36], index: 1, kind: input, shape index: {}]   ;;  %s2566_s2 = inlined_call_operand.vmem [shape: bf16[8,36], index: 2, kind: input, shape index: {}]   ;;  %s2567_s3 = inlined_call_operand.vmem [shape: bf16[8,36], index: 3, kind: input, shape index: {}]   ;;  %s2568_s4 = inlined_call_operand.vmem [shape: f32[24,1], index: 4, kind: input, shape index: {}]   ;;  %s2569_s5 = inlined_call_operand.vmem [shape: bf16[8,24], index: 5, kind: input, shape index: {}]   ;;  %s2570_s6 = inlined_call_operand.vmem [shape: f32[8,1], index: 6, kind: input, shape index: {}]   ;;  %s2571_s7 = inlined_call_operand.hbm [shape: f32[2,8,512], index: 7, kind: output, shape index: {}]  }
   0x1   :  { %14 = vsyncpa [#allocation3 + $0x1], 0  ;;  %s1942_s24 = smov 0   ;;  %s1944_s25 = smov 0  }
   0x2   :  { %s1946_s26 = smov 0   ;;  %s1948_s27 = smov 0  }
   0x3 LB: > { %s1963_s28 = sadd.s32 4294967295, %s1875_s27   ;;  %s1716_s29 = sadd.s32 4294967294, %s1875_s27   ;;  %s1875_s27 = sphi %s1948_s27, %s2577_s27   ;;  %s1871_s26 = sphi %s1946_s26, %s2576_s26   ;;  %s1867_s25 = sphi %s1944_s25, %s2575_s25   ;;  %s1863_s24 = sphi %s1942_s24, %s2574_s24  }
   0x4   : > { %s1967_s30 = sadd.s32 1, %s1875_s27   ;;  %s179_s8 = sadd.s32 1, %s1871_s26 }
   0x5   : > { %s176_s9 = ssub.s32 %s1875_s27, %s1967_s30  ;;  %p189_p0 = scmp.ne.s32.totalorder %s1871_s26, %s1867_s25 }
   0x6   : > { %p177_p1 = scmp.eq.s32.totalorder %s176_s9, 0  ;;  %p190_p2 = scmp.eq.s32.totalorder %s1963_s28, 1 }
   0x7   : > { %p195_p3 = scmp.ne.s32.totalorder %s1867_s25, %s1863_s24  ;;  %p196_p4 = scmp.eq.s32.totalorder %s1716_s29, 1 }
   0x8   : > { %s1978_s10 = scalar_select %p177_p1, %s1871_s26, %s179_s8  }
   0x9   : > { %p1980_p5 = por %p190_p2, %p189_p0  ;;  %p1984_p6 = por %p196_p4, %p195_p3 }
   0xa   : > { %p1719_p7 = scmp.ge.s32.totalorder %s1875_s27, 1  ;;  %p240_p8 = scmp.lt.s32.totalorder %s1875_s27, 3 }
   0xc   : > { %p241_p9 = pnand %p1719_p7, %p240_p8 }
   0xd   : > { %p272_p10 = scmp.lt.s32.totalorder (!%p241_p9), %s1963_s28, 1  ;;  %s1877_s18 = smov (!%p241_p9), 23  }
   0xe   : > { %244 = sbr.rel (%p241_p9) target bundleno = 871 (0x367), region = 48  ;;  %s1878_s19 = smov (!%p241_p9), 22  }
   0xf   : > { %s1879_s20 = smov (!%p241_p9), 21   ;;  %s1880_s21 = smov (!%p241_p9), 1  }
  0x10   : > { %s1881_s22 = smov (!%p241_p9), 127   ;;  %s1882_s23 = smov (!%p241_p9), 107  }
  0x11   : > { %s1883_s29 = smov (!%p241_p9), 106   ;;  %s1884_s8 = smov (!%p241_p9), 105  }
  0x12   : > { %s1885_s9 = smov (!%p241_p9), 46   ;;  %s1888_s15 = smov (!%p241_p9), 2  }
  0x13   : > { %s273_s13 = scalar_select %p272_p10, %s1963_s28, 1  ;;  %vm302_vm0 = vcmask 187392   ;;  %vm332_vm1 = vcmask 179200   ;;  %vm362_vm2 = vcmask 171008   ;;  %vm392_vm3 = vcmask 7168  }
  0x14   : > { %vm555_vm4 = vcmask 1041408   ;;  %vm567_vm5 = vcmask 1043456   ;;  %vm576_vm6 = vcmask 1045504   ;;  %s1889_s16 = smov 126   ;;  %vm507_vm7 = vcmask 859136  }
  0x15   : > { %s1744_s14 = sshll.u32 %s273_s13, 3  ;;  %s1886_s13 = smov 44   ;;  %vm417_vm8 = vcmask 1039360   ;;  %vm447_vm9 = vcmask 875520   ;;  %vm477_vm10 = vcmask 867328   ;;  %vm707_vm11 = vcmask 375808  }
  0x16   : > { %s276_s17 = scalar_lea.vmem %s2564_s0, %s1744_s14  ;;  %s1887_s14 = smov 42   ;;  %vm737_vm12 = vcmask 359424   ;;  %vm767_vm13 = vcmask 343040   ;;  %vm797_vm14 = vcmask 15360   ;;  %vm822_vm15 = vcmask 1031168  }
  0x17   : > { %v1995_v0 = vld [vmem:[%s276_s17] sm:$0xff]  ;;  %s1890_s17 = smov 86  }
  0x18   : > { %280 = vst [vmem:[#allocation1] ss:$4 sm:$0xff] %v1995_v0 }
  0x1f   : > { %v281_v1 = vld.sshfl [vmem:[#allocation1 + $0x18] sm:$0xff pattern:$0x73625140] }
  0x20   : > { %283 = vrot.lane.b32.xlu0 %v281_v1, %s1877_s18  ;;  %285 = vst [vmem:[#allocation1] ss:$4 sm:$0xff] %v1995_v0 }
  0x27   : > { %v288_v2 = vld.sshfl [vmem:[#allocation1 + $0x8] sm:$0xff pattern:$0x73625140]  ;;  %v292_v3 = vld.sshfl [vmem:[#allocation1 + $0x18] sm:$0xff pattern:$0x73625140] }
  0x28   : > { %296 = vrot.lane.b32.xlu1 %v288_v2, %s1877_s18  ;;  %v286_v4 = vld.sshfl [vmem:[#allocation1] sm:$0xff pattern:$0x73625140]  ;;  %v290_v5 = vld.sshfl [vmem:[#allocation1 + $0x10] sm:$0xff pattern:$0x73625140]  ;;  %300 = vrot.lane.b32.xlu2 %v292_v3, %s1877_s18 }
  0x29   : > { %294 = vrot.lane.b32.xlu0 %v286_v4, %s1877_s18  ;;  %310 = vst [vmem:[#allocation1] ss:$4 sm:$0xff] %v1995_v0 }
  0x30   : > { %298 = vrot.lane.b32.xlu1 %v290_v5, %s1877_s18  ;;  %v311_v6 = vld.sshfl [vmem:[#allocation1 + $0x18] sm:$0xff pattern:$0x73625140]  ;;  %s1891_s18 = smov 84  }
  0x31   : > { %315 = vst [vmem:[#allocation1] ss:$4 sm:$0xff] %v1995_v0 }
  0x38   : > { %v320_v7 = vld.sshfl [vmem:[#allocation1 + $0x10] sm:$0xff pattern:$0x73625140]  ;;  %v322_v8 = vld.sshfl [vmem:[#allocation1 + $0x18] sm:$0xff pattern:$0x73625140]  ;;  %313 = vrot.lane.b32.xlu1 %v311_v6, %s1878_s19 }
  0x39   : > { %328 = vrot.lane.b32.xlu0 %v320_v7, %s1878_s19  ;;  %v316_v9 = vld.sshfl [vmem:[#allocation1] sm:$0xff pattern:$0x73625140]  ;;  %v318_v10 = vld.sshfl [vmem:[#allocation1 + $0x8] sm:$0xff pattern:$0x73625140] }
  0x3a   : > { %340 = vst [vmem:[#allocation1] ss:$4 sm:$0xff] %v1995_v0  ;;  %326 = vrot.lane.b32.xlu2 %v318_v10, %s1878_s19 }
  0x40   : > { %330 = vrot.lane.b32.xlu1 %v322_v8, %s1878_s19 }
  0x41   : > { %v341_v11 = vld.sshfl [vmem:[#allocation1 + $0x18] sm:$0xff pattern:$0x73625140] }
  0x42   : > { %343 = vrot.lane.b32.xlu0 %v341_v11, %s1879_s20  ;;  %345 = vst [vmem:[#allocation1] ss:$4 sm:$0xff] %v1995_v0  ;;  %324 = vrot.lane.b32.xlu2 %v316_v9, %s1878_s19  ;;  %s1892_s19 = smov 82  }
  0x49   : > { %v350_v12 = vld.sshfl [vmem:[#allocation1 + $0x10] sm:$0xff pattern:$0x73625140]  ;;  %v346_v13 = vld.sshfl [vmem:[#allocation1] sm:$0xff pattern:$0x73625140] }
  0x4a   : > { %358 = vrot.lane.b32.xlu0 %v350_v12, %s1879_s20  ;;  %v348_v14 = vld.sshfl [vmem:[#allocation1 + $0x8] sm:$0xff pattern:$0x73625140]  ;;  %v352_v15 = vld.sshfl [vmem:[#allocation1 + $0x18] sm:$0xff pattern:$0x73625140] }
  0x4b   : > { %360 = vrot.lane.b32.xlu1 %v352_v15, %s1879_s20  ;;  %370 = vst [vmem:[#allocation1] ss:$4 sm:$0xff] %v1995_v0  ;;  %356 = vrot.lane.b32.xlu2 %v348_v14, %s1879_s20 }
  0x52   : > { %v371_v16 = vld.sshfl [vmem:[#allocation1 + $0x18] sm:$0xff pattern:$0x73625140] }
  0x53   : > { %375 = vst [vmem:[#allocation1] ss:$4 sm:$0xff] %v1995_v0  ;;  %354 = vrot.lane.b32.xlu1 %v346_v13, %s1879_s20  ;;  %373 = vrot.lane.b32.xlu2 %v371_v16, %s1880_s21  ;;  %s1893_s20 = smov 69  }
  0x5a   : > { %v380_v17 = vld.sshfl [vmem:[#allocation1 + $0x10] sm:$0xff pattern:$0x73625140]  ;;  %v378_v18 = vld.sshfl [vmem:[#allocation1 + $0x8] sm:$0xff pattern:$0x73625140] }
  0x5b   : > { %388 = vrot.lane.b32.xlu0 %v380_v17, %s1880_s21  ;;  %v376_v19 = vld.sshfl [vmem:[#allocation1] sm:$0xff pattern:$0x73625140]  ;;  %v382_v20 = vld.sshfl [vmem:[#allocation1 + $0x18] sm:$0xff pattern:$0x73625140]  ;;  %386 = vrot.lane.b32.xlu2 %v378_v18, %s1880_s21 }
  0x5c   : > { %390 = vrot.lane.b32.xlu1 %v382_v20, %s1880_s21  ;;  %400 = vst [vmem:[#allocation1] ss:$4 sm:$0xff] %v1995_v0 }
  0x63   : > { %384 = vrot.lane.b32.xlu0 %v376_v19, %s1880_s21  ;;  %v407_v21 = vld.sshfl [vmem:[#allocation1 + $0x18] sm:$0xff pattern:$0x73625140]  ;;  %v401_v22 = vld.sshfl [vmem:[#allocation1] sm:$0xff pattern:$0x73625140] }
  0x64   : > { %v405_v23 = vld.sshfl [vmem:[#allocation1 + $0x10] sm:$0xff pattern:$0x73625140]  ;;  %v403_v24 = vld.sshfl [vmem:[#allocation1 + $0x8] sm:$0xff pattern:$0x73625140] }
  0x65   : > { %421 = vst [vmem:[#allocation1] ss:$4 sm:$0xff] %v1995_v0  ;;  %413 = vrot.lane.b32.xlu2 %v405_v23, %s1881_s22  ;;  %s1894_s21 = smov 66  }
  0x6b   : > { %415 = vrot.lane.b32.xlu0 %v407_v21, %s1881_s22 }
  0x6c   : > { %v422_v25 = vld.sshfl [vmem:[#allocation1] sm:$0xff pattern:$0x73625140] }
  0x6d   : > { %424 = vrot.lane.b32.xlu1 %v422_v25, %s1881_s22  ;;  %430 = vst [vmem:[#allocation1] ss:$4 sm:$0xff] %v1995_v0  ;;  %409 = vrot.lane.b32.xlu2 %v401_v22, %s1881_s22 }
  0x73   : > { %411 = vrot.lane.b32.xlu0 %v403_v24, %s1881_s22  ;;  %s1895_s22 = smov 63  }
  0x74   : > { %v437_v26 = vld.sshfl [vmem:[#allocation1 + $0x18] sm:$0xff pattern:$0x73625140]  ;;  %v435_v27 = vld.sshfl [vmem:[#allocation1 + $0x10] sm:$0xff pattern:$0x73625140] }
  0x75   : > { %v433_v28 = vld.sshfl [vmem:[#allocation1 + $0x8] sm:$0xff pattern:$0x73625140]  ;;  %v431_v29 = vld.sshfl [vmem:[#allocation1] sm:$0xff pattern:$0x73625140]  ;;  %443 = vrot.lane.b32.xlu2 %v435_v27, %s1882_s23 }
  0x76   : > { %441 = vrot.lane.b32.xlu1 %v433_v28, %s1882_s23  ;;  %451 = vst [vmem:[#allocation1] ss:$4 sm:$0xff] %v1995_v0 }
  0x7b   : > { %445 = vrot.lane.b32.xlu0 %v437_v26, %s1882_s23 }
  0x7d   : > { %v452_v30 = vld.sshfl [vmem:[#allocation1] sm:$0xff pattern:$0x73625140] }
  0x7e   : > { %454 = vrot.lane.b32.xlu1 %v452_v30, %s1882_s23  ;;  %460 = vst [vmem:[#allocation1] ss:$4 sm:$0xff] %v1995_v0 }
  0x82   : > { %v301_v35 = vpop.permute.xlu2 %300 }
  0x83   : > { %439 = vrot.lane.b32.xlu0 %v431_v29, %s1882_s23  ;;  %s1896_s23 = smov 3  }
  0x85   : > { %v467_v31 = vld.sshfl [vmem:[#allocation1 + $0x18] sm:$0xff pattern:$0x73625140]  ;;  %v461_v32 = vld.sshfl [vmem:[#allocation1] sm:$0xff pattern:$0x73625140] }
  0x86   : > { %v463_v33 = vld.sshfl [vmem:[#allocation1 + $0x8] sm:$0xff pattern:$0x73625140]  ;;  %v465_v34 = vld.sshfl [vmem:[#allocation1 + $0x10] sm:$0xff pattern:$0x73625140] }
  0x87   : > { %481 = vst [vmem:[#allocation1] ss:$4 sm:$0xff] %v1995_v0  ;;  %473 = vrot.lane.b32.xlu2 %v465_v34, %s1883_s29 }
  0x8b   : > { %475 = vrot.lane.b32.xlu0 %v467_v31, %s1883_s29 }
  0x8e   : > { %v482_v36 = vld.sshfl [vmem:[#allocation1] sm:$0xff pattern:$0x73625140] }
  0x8f   : > { %484 = vrot.lane.b32.xlu1 %v482_v36, %s1883_s29  ;;  %490 = vst [vmem:[#allocation1] ss:$4 sm:$0xff] %v1995_v0  ;;  %469 = vrot.lane.b32.xlu2 %v461_v32, %s1883_s29 }
  0x92   : > { %v284_v37 = vpop.permute.xlu0 %283 }
  0x93   : > { %471 = vrot.lane.b32.xlu0 %v463_v33, %s1883_s29  ;;  %s1897_s29 = smov 125  }
  0x94   : > { %v327_v38 = vpop.permute.xlu2 %326 }
  0x96   : > { %v491_v39 = vld.sshfl [vmem:[#allocation1] sm:$0xff pattern:$0x73625140]  ;;  %v493_v40 = vld.sshfl [vmem:[#allocation1 + $0x8] sm:$0xff pattern:$0x73625140] }
  0x97   : > { %v495_v41 = vld.sshfl [vmem:[#allocation1 + $0x10] sm:$0xff pattern:$0x73625140]  ;;  %499 = vrot.lane.b32.xlu1 %v491_v39, %s1884_s8  ;;  %v497_v42 = vld.sshfl [vmem:[#allocation1 + $0x18] sm:$0xff pattern:$0x73625140] }
  0x98   : > { %511 = vst [vmem:[#allocation1] ss:$4 sm:$0xff] %v1995_v0  ;;  %503 = vrot.lane.b32.xlu2 %v495_v41, %s1884_s8 }
  0x9a   : > { %v297_v43 = vpop.permute.xlu1 %296 }
  0x9b   : > { %505 = vrot.lane.b32.xlu0 %v497_v42, %s1884_s8  ;;  %v295_v44 = vpop.permute.xlu0 %294 }
  0x9c   : > { %v2013_v45 = vsel %vm302_vm0, %v295_v44, %v297_v43  ;;  %v2015_v46 = vsel %vm302_vm0, %v284_v37, %v295_v44  ;;  %v325_v47 = vpop.permute.xlu2 %324 }
  0x9d   : > { %v2018_v48 = vsel %vm332_vm1, %v325_v47, %v327_v38 }
  0x9f   : > { %v512_v49 = vld.sshfl [vmem:[#allocation1] sm:$0xff pattern:$0x73625140] }
  0xa0   : > { %514 = vrot.lane.b32.xlu1 %v512_v49, %s1884_s8  ;;  %535 = vst [vmem:[#allocation1] ss:$4 sm:$0xff] %v1995_v0  ;;  %501 = vrot.lane.b32.xlu2 %v493_v40, %s1884_s8  ;;  %s1898_s8 = smov 65  }
  0xa2   : > { %v299_v50 = vpop.permute.xlu1 %298 }
  0xa3   : > { %v2021_v51 = vsel %vm302_vm0, %v297_v43, %v299_v50  ;;  %v2023_v52 = vsel %vm302_vm0, %v299_v50, %v301_v35  ;;  %vm852_vm0 = vcmask 703488  }
  0xa5   : > { %v2025_v53 = vpop.permute.xlu2 %356 }
  0xa7   : > { %v2027_v54 = vld.sshfl [vmem:[#allocation1] sm:$0xff pattern:$0x73625140]  ;;  %v2029_v55 = vld.sshfl [vmem:[#allocation1 + $0x8] sm:$0xff pattern:$0x73625140] }
  0xa8   : > { %v2031_v56 = vld.sshfl [vmem:[#allocation1 + $0x10] sm:$0xff pattern:$0x73625140]  ;;  %v2033_v57 = vld.sshfl [vmem:[#allocation1 + $0x18] sm:$0xff pattern:$0x73625140] }
  0xa9   : > { %685 = vst [vmem:[#allocation1] ss:$4 sm:$0xff] %v1995_v0 }
  0xaa   : > { %v314_v58 = vpop.permute.xlu1 %313 }
  0xab   : > { %v329_v59 = vpop.permute.xlu0 %328  ;;  %v2037_v60 = vsel %vm332_vm1, %v314_v58, %v325_v47 }
  0xac   : > { %v2040_v61 = vsel %vm332_vm1, %v327_v38, %v329_v59  ;;  %v522_v38 = vrot.slane %v2018_v48, 6  ;;  %v521_v42 = vrot.slane %v2037_v60, 6 }
  0xad   : > { %v2042_v62 = vpop.permute.xlu2 %373  ;;  %v523_v41 = vrot.slane %v2040_v61, 6 }
  0xb0   : > { %v686_v63 = vld.sshfl [vmem:[#allocation1 + $0x18] sm:$0xff pattern:$0x73625140] }
  0xb1   : > { %688 = vrot.lane.b32.xlu1 %v686_v63, %s1885_s9  ;;  %690 = vst [vmem:[#allocation1] ss:$4 sm:$0xff] %v1995_v0 }
  0xb2   : > { %v331_v1 = vpop.permute.xlu1 %330 }
  0xb3   : > { %v2046_v2 = vsel %vm332_vm1, %v329_v59, %v331_v1  ;;  %vm882_vm1 = vcmask 687104  }
  0xb4   : > { %v344_v3 = vpop.permute.xlu0 %343  ;;  %v524_v43 = vrot.slane %v2046_v2, 6  ;;  %v560_v2 = vsel %vm555_vm4, %v2013_v45, %v522_v38 }
  0xb5   : > { %v387_v8 = vpop.permute.xlu2 %386 }
  0xb8   : > { %v697_v4 = vld.sshfl [vmem:[#allocation1 + $0x18] sm:$0xff pattern:$0x73625140]  ;;  %v691_v5 = vld.sshfl [vmem:[#allocation1] sm:$0xff pattern:$0x73625140] }
  0xb9   : > { %705 = vrot.lane.b32.xlu0 %v697_v4, %s1885_s9  ;;  %v695_v6 = vld.sshfl [vmem:[#allocation1 + $0x10] sm:$0xff pattern:$0x73625140]  ;;  %v693_v7 = vld.sshfl [vmem:[#allocation1 + $0x8] sm:$0xff pattern:$0x73625140]  ;;  %v563_v4 = vsel %vm555_vm4, %v2021_v51, %v523_v41 }
  0xba   : > { %701 = vrot.lane.b32.xlu1 %v693_v7, %s1885_s9  ;;  %715 = vst [vmem:[#allocation1] ss:$4 sm:$0xff] %v1995_v0  ;;  %703 = vrot.lane.b32.xlu2 %v695_v6, %s1885_s9 }
  0xbc   : > { %v359_v9 = vpop.permute.xlu0 %358 }
  0xbd   : > { %v2051_v10 = vsel %vm362_vm2, %v2025_v53, %v359_v9  ;;  %v361_v11 = vpop.permute.xlu1 %360 }
  0xbe   : > { %v2054_v12 = vsel %vm362_vm2, %v359_v9, %v361_v11  ;;  %v528_v44 = vrot.slane %v2051_v10, 4 }
  0xbf   : > { %v2057_v14 = vpop.permute.xlu2 %413  ;;  %v529_v47 = vrot.slane %v2054_v12, 4 }
  0xc1   : > { %v716_v13 = vld.sshfl [vmem:[#allocation1 + $0x18] sm:$0xff pattern:$0x73625140] }
  0xc2   : > { %718 = vrot.lane.b32.xlu0 %v716_v13, %s1886_s13  ;;  %720 = vst [vmem:[#allocation1] ss:$4 sm:$0xff] %v1995_v0  ;;  %699 = vrot.lane.b32.xlu2 %v691_v5, %s1885_s9  ;;  %s1899_s9 = smov 62  }
  0xc5   : > { %v355_v22 = vpop.permute.xlu1 %354 }
  0xc6   : > { %v363_v36 = vsel %vm362_vm2, %v355_v22, %v2025_v53  ;;  %v369_v37 = vsel %vm362_vm2, %v344_v3, %v355_v22  ;;  %v557_v3 = vsel %vm555_vm4, %v2015_v46, %v521_v42  ;;  %v573_v46 = vsel %vm567_vm5, %v563_v4, %v528_v44 }
  0xc7   : > { %v2060_v20 = vpop.permute.xlu2 %409  ;;  %v526_v50 = vrot.slane %v369_v37, 4  ;;  %v527_v53 = vrot.slane %v363_v36, 4  ;;  %vm912_vm2 = vcmask 670720  }
  0xc9   : > { %v723_v15 = vld.sshfl [vmem:[#allocation1 + $0x8] sm:$0xff pattern:$0x73625140]  ;;  %v725_v16 = vld.sshfl [vmem:[#allocation1 + $0x10] sm:$0xff pattern:$0x73625140]  ;;  %v571_v9 = vsel %vm567_vm5, %v560_v2, %v527_v53  ;;  %v569_v45 = vsel %vm567_vm5, %v557_v3, %v526_v50 }
  0xca   : > { %731 = vrot.lane.b32.xlu1 %v723_v15, %s1886_s13  ;;  %v727_v17 = vld.sshfl [vmem:[#allocation1 + $0x18] sm:$0xff pattern:$0x73625140]  ;;  %v721_v18 = vld.sshfl [vmem:[#allocation1] sm:$0xff pattern:$0x73625140]  ;;  %733 = vrot.lane.b32.xlu2 %v725_v16, %s1886_s13 }
  0xcb   : > { %735 = vrot.lane.b32.xlu0 %v727_v17, %s1886_s13  ;;  %745 = vst [vmem:[#allocation1] ss:$4 sm:$0xff] %v1995_v0 }
  0xcd   : > { %v389_v19 = vpop.permute.xlu0 %388 }
  0xce   : > { %v2063_v21 = vsel %vm392_vm3, %v387_v8, %v389_v19  ;;  %v391_v26 = vpop.permute.xlu1 %390 }
  0xcf   : > { %v2066_v25 = vpop.permute.xlu2 %443  ;;  %v533_v49 = vrot.slane %v2063_v21, 2 }
  0xd1   : > { %v2115_v11 = vsel %vm576_vm6, %v573_v46, %v533_v49 }
  0xd2   : > { %729 = vrot.lane.b32.xlu1 %v721_v18, %s1886_s13  ;;  %v746_v23 = vld.sshfl [vmem:[#allocation1 + $0x18] sm:$0xff pattern:$0x73625140]  ;;  %s1900_s13 = smov 59  }
  0xd3   : > { %750 = vst [vmem:[#allocation1] ss:$4 sm:$0xff] %v1995_v0  ;;  %748 = vrot.lane.b32.xlu2 %v746_v23, %s1887_s14 }
  0xd5   : > { %v385_v24 = vpop.permute.xlu0 %384 }
  0xd6   : > { %v393_v39 = vsel %vm392_vm3, %v385_v24, %v387_v8  ;;  %v399_v40 = vsel %vm392_vm3, %v2042_v62, %v385_v24  ;;  %v395_v62 = vsel %vm392_vm3, %v389_v19, %v391_v26  ;;  %v566_v8 = vsel %vm555_vm4, %v2023_v52, %v524_v43 }
  0xd7   : > { %v531_v58 = vrot.slane %v399_v40, 2  ;;  %v532_v59 = vrot.slane %v393_v39, 2  ;;  %v534_v5 = vrot.slane %v395_v62, 2  ;;  %v575_v12 = vsel %vm567_vm5, %v566_v8, %v529_v47 }
  0xd8   : > { %vm1108_vm3 = vcmask 564224  }
  0xd9   : > { %v2109_v10 = vsel %vm576_vm6, %v571_v9, %v532_v59  ;;  %v2112_v51 = vsel %vm576_vm6, %v569_v45, %v531_v58  ;;  %v2119_v13 = vsel %vm576_vm6, %v575_v12, %v534_v5 }
  0xda   : > { %v757_v27 = vld.sshfl [vmem:[#allocation1 + $0x18] sm:$0xff pattern:$0x73625140]  ;;  %v755_v28 = vld.sshfl [vmem:[#allocation1 + $0x10] sm:$0xff pattern:$0x73625140] }
  0xdb   : > { %765 = vrot.lane.b32.xlu0 %v757_v27, %s1887_s14  ;;  %v753_v29 = vld.sshfl [vmem:[#allocation1 + $0x8] sm:$0xff pattern:$0x73625140]  ;;  %v751_v30 = vld.sshfl [vmem:[#allocation1] sm:$0xff pattern:$0x73625140]  ;;  %763 = vrot.lane.b32.xlu2 %v755_v28, %s1887_s14 }
  0xdc   : > { %761 = vrot.lane.b32.xlu1 %v753_v29, %s1887_s14  ;;  %775 = vst [vmem:[#allocation1] ss:$4 sm:$0xff] %v1995_v0 }
  0xdd   : > { %v2069_v31 = vpop.permute.xlu0 %415 }
  0xde   : > { %v420_v41 = vsel %vm417_vm8, %v2057_v14, %v2069_v31 }
  0xdf   : > { %v2073_v34 = vpop.permute.xlu1 %424  ;;  %v543_v53 = vrot.slane %v420_v41, 6 }
  0xe1   : > { %v2071_v32 = vpop.permute.xlu2 %473  ;;  %v594_v3 = vsel %vm555_vm4, %v2031_v56, %v543_v53 }
  0xe3   : > { %759 = vrot.lane.b32.xlu0 %v751_v30, %s1887_s14  ;;  %v776_v33 = vld.sshfl [vmem:[#allocation1 + $0x18] sm:$0xff pattern:$0x73625140] }
  0xe4   : > { %780 = vst [vmem:[#allocation1] ss:$4 sm:$0xff] %v1995_v0 }
  0xe5   : > { %v2076_v35 = vpop.permute.xlu0 %411 }
  0xe6   : > { %v419_v24 = vsel %vm417_vm8, %v2076_v35, %v2057_v14 }
  0xe7   : > { %v542_v29 = vrot.slane %v419_v24, 6 }
  0xe8   : > { %v442_v7 = vpop.permute.xlu1 %441 }
  0xe9   : > { %v2091_v48 = vpop.permute.xlu2 %469  ;;  %v449_v30 = vsel %vm447_vm9, %v442_v7, %v2066_v25  ;;  %v592_v40 = vsel %vm555_vm4, %v2029_v55, %v542_v29 }
  0xea   : > { %v547_v38 = vrot.slane %v449_v30, 4 }
  0xeb   : > { %v783_v61 = vld.sshfl [vmem:[#allocation1 + $0x8] sm:$0xff pattern:$0x73625140]  ;;  %v785_v63 = vld.sshfl [vmem:[#allocation1 + $0x10] sm:$0xff pattern:$0x73625140]  ;;  %778 = vrot.lane.b32.xlu0 %v776_v33, %s1888_s15  ;;  %v418_v33 = vsel %vm417_vm8, %v2060_v20, %v2076_v35 }
  0xec   : > { %791 = vrot.lane.b32.xlu1 %v783_v61, %s1888_s15  ;;  %v781_v60 = vld.sshfl [vmem:[#allocation1] sm:$0xff pattern:$0x73625140]  ;;  %v787_v1 = vld.sshfl [vmem:[#allocation1 + $0x18] sm:$0xff pattern:$0x73625140]  ;;  %793 = vrot.lane.b32.xlu2 %v785_v63, %s1888_s15  ;;  %v600_v50 = vsel %vm567_vm5, %v592_v40, %v547_v38 }
  0xed   : > { %v2100_v6 = vpop.permute.xlu0 %445  ;;  %805 = vst [vmem:[#allocation1] ss:$4 sm:$0xff] %v1995_v0  ;;  %v541_v39 = vrot.slane %v418_v33, 6 }
  0xee   : > { %v450_v14 = vsel %vm447_vm9, %v2066_v25, %v2100_v6 }
  0xef   : > { %v590_v59 = vsel %vm555_vm4, %v2027_v54, %v541_v39 }
  0xf0   : > { %v455_v21 = vpop.permute.xlu1 %454 }
  0xf2   : > { %v2121_v52 = vpop.permute.xlu2 %503 }
  0xf3   : > { %795 = vrot.lane.b32.xlu0 %v787_v1, %s1888_s15 }
  0xf4   : > { %789 = vrot.lane.b32.xlu1 %v781_v60, %s1888_s15  ;;  %v812_v15 = vld.sshfl [vmem:[#allocation1 + $0x18] sm:$0xff pattern:$0x73625140]  ;;  %v810_v16 = vld.sshfl [vmem:[#allocation1 + $0x10] sm:$0xff pattern:$0x73625140] }
  0xf5   : > { %v440_v17 = vpop.permute.xlu0 %439  ;;  %v806_v18 = vld.sshfl [vmem:[#allocation1] sm:$0xff pattern:$0x73625140]  ;;  %v808_v19 = vld.sshfl [vmem:[#allocation1 + $0x8] sm:$0xff pattern:$0x73625140] }
  0xf6   : > { %816 = vrot.lane.b32.xlu2 %v808_v19, %s1889_s16  ;;  %826 = vst [vmem:[#allocation1] ss:$4 sm:$0xff] %v1995_v0  ;;  %v448_v36 = vsel %vm447_vm9, %v440_v17, %v442_v7  ;;  %v548_v60 = vrot.slane %v450_v14, 4  ;;  %s1833_s15 = scalar_lea.hbm %s2571_s7, 64 }
  0xf7   : > { %v546_v42 = vrot.slane %v448_v36, 4 }
  0xf8   : > { %v602_v9 = vsel %vm567_vm5, %v594_v3, %v548_v60 }
  0xf9   : > { %v598_v2 = vsel %vm567_vm5, %v590_v59, %v546_v42 }
  0xfa   : > { %v502_v22 = vpop.permute.xlu2 %501 }
  0xfb   : > { %818 = vrot.lane.b32.xlu0 %v810_v16, %s1889_s16  ;;  %v509_v23 = vsel %vm507_vm7, %v502_v22, %v2121_v52 }
  0xfc   : > { %820 = vrot.lane.b32.xlu1 %v812_v15, %s1889_s16  ;;  %v626_v26 = vsel %vm555_vm4, %v509_v23, 0 }
  0xfd   : > { %v476_v27 = vpop.permute.xlu0 %475  ;;  %v827_v28 = vld.sshfl [vmem:[#allocation1] sm:$0xff pattern:$0x73625140]  ;;  %651 = vmatpush.bf16.msra.mxu1 %v626_v26 }
  0xfe   : > { %835 = vst [vmem:[#allocation1] ss:$4 sm:$0xff] %v1995_v0  ;;  %829 = vrot.lane.b32.xlu2 %v827_v28, %s1889_s16  ;;  %v480_v25 = vsel %vm477_vm10, %v2071_v32, %v476_v27 }
 0x101   : > { %v485_v37 = vpop.permute.xlu1 %484 }
 0x102   : > { %v489_v45 = vsel %vm477_vm10, %v476_v27, %v485_v37 }
 0x103   : > { %v554_v12 = vrot.slane %v489_v45, 2 }
 0x104   : > { %814 = vrot.lane.b32.xlu1 %v806_v18, %s1889_s16  ;;  %s269_s16 = sand.u32 1, %s1867_s25  }
 0x105   : > { %v842_v43 = vld.sshfl [vmem:[#allocation1 + $0x18] sm:$0xff pattern:$0x73625140]  ;;  %v836_v44 = vld.sshfl [vmem:[#allocation1] sm:$0xff pattern:$0x73625140]  ;;  %v472_v47 = vpop.permute.xlu0 %471 }
 0x106   : > { %850 = vrot.lane.b32.xlu0 %v842_v43, %s1890_s17  ;;  %v838_v20 = vld.sshfl [vmem:[#allocation1 + $0x8] sm:$0xff pattern:$0x73625140]  ;;  %v840_v35 = vld.sshfl [vmem:[#allocation1 + $0x10] sm:$0xff pattern:$0x73625140]  ;;  %v478_v49 = vsel %vm477_vm10, %v2091_v48, %v472_v47  ;;  %v479_v55 = vsel %vm477_vm10, %v472_v47, %v2071_v32  ;;  %v429_v48 = vsel %vm417_vm8, %v2069_v31, %v2073_v34  ;;  %v459_v31 = vsel %vm447_vm9, %v2100_v6, %v455_v21 }
 0x107   : > { %856 = vst [vmem:[#allocation1] ss:$4 sm:$0xff] %v1995_v0  ;;  %v552_v58 = vrot.slane %v479_v55, 2  ;;  %848 = vrot.lane.b32.xlu2 %v840_v35, %s1890_s17  ;;  %v551_v62 = vrot.slane %v478_v49, 2  ;;  %v544_v4 = vrot.slane %v429_v48, 6  ;;  %v553_v34 = vrot.slane %v480_v25, 2 }
 0x108   : > { %v549_v56 = vrot.slane %v459_v31, 4  ;;  %vm1168_vm8 = vcmask 515072   ;;  %vm618_vm9 = vcmask 293888   ;;  %vm1313_vm10 = vcmask 482304  }
 0x109   : > { %v500_v61 = vpop.permute.xlu1 %499  ;;  %v609_v63 = vsel %vm576_vm6, %v600_v50, %v552_v58  ;;  %v606_v5 = vsel %vm576_vm6, %v598_v2, %v551_v62  ;;  %v596_v46 = vsel %vm555_vm4, %v2033_v57, %v544_v4 }
 0x10a   : > { %v508_v1 = vsel %vm507_vm7, %v500_v61, %v502_v22  ;;  %652 = vmatpush.bf16.msra.mxu1 %v609_v63  ;;  %v604_v16 = vsel %vm567_vm5, %v596_v46, %v549_v56 }
 0x10b   : > { %v623_v54 = vsel %vm555_vm4, %v508_v1, 0  ;;  %v615_v21 = vsel %vm576_vm6, %v604_v16, %v554_v12 }
 0x10c   : > { %638 = vmatpush.bf16.msra.mxu0 %v623_v54 }
 0x10d   : > { %v506_v7 = vpop.permute.xlu0 %505 }
 0x10e   : > { %v857_v32 = vld.sshfl [vmem:[#allocation1] sm:$0xff pattern:$0x73625140]  ;;  %846 = vrot.lane.b32.xlu0 %v838_v20, %s1890_s17  ;;  %653 = vmatpush.bf16.msra.mxu1 %v2109_v10  ;;  %v510_v8 = vsel %vm507_vm7, %v2121_v52, %v506_v7  ;;  %v612_v10 = vsel %vm576_vm6, %v602_v9, %v553_v34 }
 0x10f   : > { %859 = vrot.lane.b32.xlu1 %v857_v32, %s1890_s17  ;;  %865 = vst [vmem:[#allocation1] ss:$4 sm:$0xff] %v1995_v0  ;;  %v629_v6 = vsel %vm555_vm4, %v510_v8, 0  ;;  %844 = vrot.lane.b32.xlu2 %v836_v44, %s1890_s17  ;;  %s1720_s17 = sshll.u32 %s269_s16, 5 }
 0x110   : > { %639 = vmatpush.bf16.msra.mxu0 %v606_v5  ;;  %664 = vmatpush.bf16.msra.mxu2 %v629_v6 }
 0x112   : > { %v515_v52 = vpop.permute.xlu1 %514 }
 0x113   : > { %v519_v15 = vsel %vm507_vm7, %v506_v7, %v515_v52  ;;  %vm1138_vm7 = vcmask 539648  }
 0x114   : > { %640 = vmatpush.bf16.msra.mxu0 %v2112_v51  ;;  %v631_v17 = vsel %vm555_vm4, %v519_v15, 0  ;;  %665 = vmatpush.bf16.msra.mxu2 %v612_v10  ;;  %v704_v23 = vpop.permute.xlu2 %703 }
 0x115   : > { %677 = vmatpush.bf16.msra.mxu3 %v631_v17 }
 0x116   : > { %v870_v18 = vld.sshfl [vmem:[#allocation1 + $0x10] sm:$0xff pattern:$0x73625140]  ;;  %v872_v19 = vld.sshfl [vmem:[#allocation1 + $0x18] sm:$0xff pattern:$0x73625140] }
 0x117   : > { %878 = vrot.lane.b32.xlu1 %v870_v18, %s1891_s18  ;;  %v868_v57 = vld.sshfl [vmem:[#allocation1 + $0x8] sm:$0xff pattern:$0x73625140]  ;;  %v866_v22 = vld.sshfl [vmem:[#allocation1] sm:$0xff pattern:$0x73625140]  ;;  %880 = vrot.lane.b32.xlu2 %v872_v19, %s1891_s18 }
 0x118   : > { %886 = vst [vmem:[#allocation1] ss:$4 sm:$0xff] %v1995_v0  ;;  %666 = vmatpush.bf16.msra.mxu2 %v2115_v11 }
 0x119   : > { %678 = vmatpush.bf16.msra.mxu3 %v615_v21 }
 0x11c   : > { %v700_v26 = vpop.permute.xlu2 %699 }
 0x11d   : > { %679 = vmatpush.bf16.msra.mxu3 %v2119_v13 }
 0x11f   : > { %874 = vrot.lane.b32.xlu1 %v866_v22, %s1891_s18  ;;  %v887_v51 = vld.sshfl [vmem:[#allocation1] sm:$0xff pattern:$0x73625140]  ;;  %876 = vrot.lane.b32.xlu2 %v868_v57, %s1891_s18 }
 0x120   : > { %889 = vrot.lane.b32.xlu0 %v887_v51, %s1891_s18  ;;  %895 = vst [vmem:[#allocation1] ss:$4 sm:$0xff] %v1995_v0  ;;  %s271_s18 = scalar_lea.vmem [#allocation2], %s1720_s17 }
 0x123   : > { %v689_v24 = vpop.permute.xlu1 %688 }
 0x124   : > { %v2192_v27 = vsel %vm707_vm11, %v689_v24, %v700_v26  ;;  %v734_v41 = vpop.permute.xlu2 %733 }
 0x127   : > { %v902_v28 = vld.sshfl [vmem:[#allocation1 + $0x18] sm:$0xff pattern:$0x73625140]  ;;  %v900_v29 = vld.sshfl [vmem:[#allocation1 + $0x10] sm:$0xff pattern:$0x73625140] }
 0x128   : > { %910 = vrot.lane.b32.xlu1 %v902_v28, %s1892_s19  ;;  %908 = vrot.lane.b32.xlu0 %v900_v29, %s1892_s19  ;;  %v898_v11 = vld.sshfl [vmem:[#allocation1 + $0x8] sm:$0xff pattern:$0x73625140]  ;;  %v896_v30 = vld.sshfl [vmem:[#allocation1] sm:$0xff pattern:$0x73625140] }
 0x129   : > { %916 = vst [vmem:[#allocation1] ss:$4 sm:$0xff] %v1995_v0 }
 0x12b   : > { %v706_v13 = vpop.permute.xlu0 %705 }
 0x12c   : > { %v2196_v33 = vsel %vm707_vm11, %v704_v23, %v706_v13  ;;  %v702_v36 = vpop.permute.xlu1 %701 }
 0x12d   : > { %v2199_v37 = vsel %vm707_vm11, %v702_v36, %v704_v23  ;;  %v2202_v38 = vsel %vm707_vm11, %v700_v26, %v702_v36  ;;  %v749_v50 = vpop.permute.xlu2 %748  ;;  %vm1223_vm11 = vcmask 1022976  }
 0x130   : > { %906 = vrot.lane.b32.xlu1 %v898_v11, %s1892_s19  ;;  %904 = vrot.lane.b32.xlu0 %v896_v30, %s1892_s19  ;;  %v917_v39 = vld.sshfl [vmem:[#allocation1] sm:$0xff pattern:$0x73625140] }
 0x131   : > { %919 = vrot.lane.b32.xlu2 %v917_v39, %s1892_s19  ;;  %940 = vst [vmem:[#allocation1] ss:$4 sm:$0xff] %v1995_v0  ;;  %s1745_s19 = sshll.u32 %s1963_s28, 5  ;;  %s1641_s28 = scalar_lea.sflag [#allocation3], %s269_s16 }
 0x134   : > { %v719_v40 = vpop.permute.xlu0 %718 }
 0x135   : > { %v764_v48 = vpop.permute.xlu2 %763 }
 0x138   : > { %v2205_v42 = vld.sshfl [vmem:[#allocation1] sm:$0xff pattern:$0x73625140]  ;;  %v2207_v43 = vld.sshfl [vmem:[#allocation1 + $0x8] sm:$0xff pattern:$0x73625140] }
 0x139   : > { %v2209_v44 = vld.sshfl [vmem:[#allocation1 + $0x10] sm:$0xff pattern:$0x73625140]  ;;  %v2211_v47 = vld.sshfl [vmem:[#allocation1 + $0x18] sm:$0xff pattern:$0x73625140] }
 0x13a   : > { %1086 = vst [vmem:[#allocation1] ss:$4 sm:$0xff] %v1995_v0 }
 0x13c   : > { %v732_v20 = vpop.permute.xlu1 %731 }
 0x13d   : > { %v739_v35 = vsel %vm737_vm12, %v732_v20, %v734_v41  ;;  %v736_v49 = vpop.permute.xlu0 %735 }
 0x13e   : > { %v740_v55 = vsel %vm737_vm12, %v734_v41, %v736_v49  ;;  %v928_v7 = vrot.slane %v739_v35, 6 }
 0x13f   : > { %v929_v32 = vrot.slane %v740_v55, 6 }
 0x140   : > { %v967_v15 = vsel %vm555_vm4, %v2199_v37, %v928_v7 }
 0x141   : > { %v2214_v53 = vld.sshfl [vmem:[#allocation1 + $0x18] sm:$0xff pattern:$0x73625140]  ;;  %v970_v16 = vsel %vm555_vm4, %v2196_v33, %v929_v32 }
 0x142   : > { %1091 = vst [vmem:[#allocation1] ss:$4 sm:$0xff] %v1995_v0 }
 0x144   : > { %v730_v14 = vpop.permute.xlu1 %729 }
 0x145   : > { %v738_v58 = vsel %vm737_vm12, %v730_v14, %v732_v20  ;;  %v744_v59 = vsel %vm737_vm12, %v719_v40, %v730_v14  ;;  %vm1253_vm12 = vcmask 531456  }
 0x146   : > { %v2225_v4 = vpop.permute.xlu2 %793  ;;  %v926_v8 = vrot.slane %v744_v59, 6  ;;  %v927_v23 = vrot.slane %v738_v58, 6 }
 0x148   : > { %v961_v17 = vsel %vm555_vm4, %v2192_v27, %v926_v8  ;;  %v964_v26 = vsel %vm555_vm4, %v2202_v38, %v927_v23 }
 0x149   : > { %v1096_v62 = vld.sshfl [vmem:[#allocation1 + $0x10] sm:$0xff pattern:$0x73625140]  ;;  %v2217_v61 = vld.sshfl [vmem:[#allocation1] sm:$0xff pattern:$0x73625140] }
 0x14a   : > { %1104 = vrot.lane.b32.xlu0 %v1096_v62, %s1893_s20  ;;  %v1094_v63 = vld.sshfl [vmem:[#allocation1 + $0x8] sm:$0xff pattern:$0x73625140]  ;;  %v1098_v60 = vld.sshfl [vmem:[#allocation1 + $0x18] sm:$0xff pattern:$0x73625140] }
 0x14b   : > { %1106 = vrot.lane.b32.xlu1 %v1098_v60, %s1893_s20  ;;  %1116 = vst [vmem:[#allocation1] ss:$4 sm:$0xff] %v1995_v0  ;;  %1102 = vrot.lane.b32.xlu2 %v1094_v63, %s1893_s20 }
 0x14d   : > { %v766_v25 = vpop.permute.xlu0 %765 }
 0x14e   : > { %v770_v1 = vsel %vm767_vm13, %v764_v48, %v766_v25  ;;  %v762_v2 = vpop.permute.xlu1 %761 }
 0x14f   : > { %v769_v54 = vsel %vm767_vm13, %v762_v2, %v764_v48  ;;  %v934_v9 = vrot.slane %v770_v1, 4 }
 0x150   : > { %v933_v56 = vrot.slane %v769_v54, 4  ;;  %v2233_v52 = vpop.permute.xlu2 %816 }
 0x151   : > { %v2248_v21 = vsel %vm567_vm5, %v970_v16, %v934_v9 }
 0x152   : > { %v2223_v3 = vld.sshfl [vmem:[#allocation1 + $0x18] sm:$0xff pattern:$0x73625140]  ;;  %v2245_v19 = vsel %vm567_vm5, %v967_v15, %v933_v56 }
 0x153   : > { %1121 = vst [vmem:[#allocation1] ss:$4 sm:$0xff] %v1995_v0 }
 0x155   : > { %v760_v31 = vpop.permute.xlu0 %759 }
 0x156   : > { %v768_v34 = vsel %vm767_vm13, %v760_v31, %v762_v2  ;;  %v774_v5 = vsel %vm767_vm13, %v749_v50, %v760_v31  ;;  %vm1283_vm13 = vcmask 506880  }
 0x157   : > { %v931_v45 = vrot.slane %v774_v5, 4  ;;  %v932_v51 = vrot.slane %v768_v34, 4 }
 0x158   : > { %v830_v28 = vpop.permute.xlu2 %829 }
 0x159   : > { %v2251_v57 = vsel %vm567_vm5, %v961_v17, %v931_v45  ;;  %v974_v29 = vsel %vm567_vm5, %v964_v26, %v932_v51 }
 0x15a   : > { %v1126_v6 = vld.sshfl [vmem:[#allocation1 + $0x10] sm:$0xff pattern:$0x73625140]  ;;  %v2228_v46 = vld.sshfl [vmem:[#allocation1] sm:$0xff pattern:$0x73625140] }
 0x15b   : > { %1134 = vrot.lane.b32.xlu0 %v1126_v6, %s1894_s21  ;;  %v1124_v10 = vld.sshfl [vmem:[#allocation1 + $0x8] sm:$0xff pattern:$0x73625140]  ;;  %v1128_v12 = vld.sshfl [vmem:[#allocation1 + $0x18] sm:$0xff pattern:$0x73625140] }
 0x15c   : > { %1136 = vrot.lane.b32.xlu1 %v1128_v12, %s1894_s21  ;;  %1146 = vst [vmem:[#allocation1] ss:$4 sm:$0xff] %v1995_v0  ;;  %1132 = vrot.lane.b32.xlu2 %v1124_v10, %s1894_s21 }
 0x15d   : > { %v2253_v22 = vpop.permute.xlu0 %778 }
 0x15e   : > { %v2242_v18 = vpop.permute.xlu1 %791 }
 0x161   : > { %v2277_v41 = vpop.permute.xlu2 %848 }
 0x163   : > { %v2255_v24 = vld.sshfl [vmem:[#allocation1 + $0x18] sm:$0xff pattern:$0x73625140] }
 0x164   : > { %1151 = vst [vmem:[#allocation1] ss:$4 sm:$0xff] %v1995_v0 }
 0x165   : > { %v2266_v13 = vpop.permute.xlu0 %795 }
 0x166   : > { %v2260_v27 = vpop.permute.xlu1 %789 }
 0x167   : > { %v798_v11 = vsel %vm797_vm14, %v2260_v27, %v2242_v18 }
 0x168   : > { %v937_v30 = vrot.slane %v798_v11, 2 }
 0x169   : > { %v2282_v55 = vpop.permute.xlu2 %844 }
 0x16a   : > { %v2269_v33 = vsel %vm576_vm6, %v974_v29, %v937_v30 }
 0x16b   : > { %v1156_v36 = vld.sshfl [vmem:[#allocation1 + $0x10] sm:$0xff pattern:$0x73625140]  ;;  %v2271_v37 = vld.sshfl [vmem:[#allocation1] sm:$0xff pattern:$0x73625140] }
 0x16c   : > { %1164 = vrot.lane.b32.xlu0 %v1156_v36, %s1895_s22  ;;  %v1158_v38 = vld.sshfl [vmem:[#allocation1 + $0x18] sm:$0xff pattern:$0x73625140]  ;;  %v1154_v39 = vld.sshfl [vmem:[#allocation1 + $0x8] sm:$0xff pattern:$0x73625140] }
 0x16d   : > { %1166 = vrot.lane.b32.xlu1 %v1158_v38, %s1895_s22  ;;  %1162 = vrot.lane.b32.xlu2 %v1154_v39, %s1895_s22  ;;  %1176 = vst [vmem:[#allocation1] ss:$4 sm:$0xff] %v1995_v0  ;;  %v819_v35 = vpop.permute.xlu0 %818 }
 0x16e   : > { %v821_v40 = vpop.permute.xlu1 %820  ;;  %v824_v38 = vsel %vm822_vm15, %v2233_v52, %v819_v35 }
 0x16f   : > { %v834_v7 = vsel %vm822_vm15, %v821_v40, %v830_v28  ;;  %v825_v32 = vsel %vm822_vm15, %v819_v35, %v821_v40  ;;  %v947_v35 = vrot.slane %v824_v38, 6 }
 0x170   : > { %v949_v6 = vrot.slane %v834_v7, 6  ;;  %v948_v10 = vrot.slane %v825_v32, 6 }
 0x171   : > { %v881_v63 = vpop.permute.xlu2 %880 }
 0x172   : > { %v996_v11 = vsel %vm555_vm4, %v2209_v44, %v948_v10  ;;  %v998_v30 = vsel %vm555_vm4, %v2211_v47, %v949_v6 }
 0x174   : > { %v2279_v20 = vld.sshfl [vmem:[#allocation1 + $0x18] sm:$0xff pattern:$0x73625140] }
 0x175   : > { %1181 = vst [vmem:[#allocation1] ss:$4 sm:$0xff] %v1995_v0 }
 0x176   : > { %v815_v49 = vpop.permute.xlu1 %814 }
 0x177   : > { %v823_v36 = vsel %vm822_vm15, %v815_v49, %v2233_v52 }
 0x178   : > { %v851_v48 = vpop.permute.xlu0 %850 }
 0x179   : > { %v877_v5 = vpop.permute.xlu2 %876  ;;  %v855_v9 = vsel %vm852_vm0, %v2277_v41, %v851_v48 }
 0x17a   : > { %v953_v12 = vrot.slane %v855_v9, 4  ;;  %v804_v9 = vsel %vm797_vm14, %v2253_v22, %v2260_v27 }
 0x17c   : > { %v1188_v50 = vld.sshfl [vmem:[#allocation1 + $0x18] sm:$0xff pattern:$0x73625140]  ;;  %v2284_v14 = vld.sshfl [vmem:[#allocation1] sm:$0xff pattern:$0x73625140] }
 0x17d   : > { %1196 = vrot.lane.b32.xlu1 %v1188_v50, %s1896_s23  ;;  %v1186_v58 = vld.sshfl [vmem:[#allocation1 + $0x10] sm:$0xff pattern:$0x73625140]  ;;  %v1184_v59 = vld.sshfl [vmem:[#allocation1 + $0x8] sm:$0xff pattern:$0x73625140] }
 0x17e   : > { %1194 = vrot.lane.b32.xlu0 %v1186_v58, %s1896_s23  ;;  %1192 = vrot.lane.b32.xlu2 %v1184_v59, %s1896_s23  ;;  %1206 = vst [vmem:[#allocation1] ss:$4 sm:$0xff] %v1995_v0 }
 0x180   : > { %v847_v54 = vpop.permute.xlu0 %846 }
 0x181   : > { %v860_v62 = vpop.permute.xlu1 %859  ;;  %v853_v47 = vsel %vm852_vm0, %v2282_v55, %v847_v54 }
 0x182   : > { %v864_v56 = vsel %vm852_vm0, %v851_v48, %v860_v62  ;;  %v1004_v62 = vsel %vm567_vm5, %v996_v11, %v953_v12 }
 0x183   : > { %v954_v15 = vrot.slane %v864_v56, 4 }
 0x185   : > { %v1213_v60 = vld.sshfl [vmem:[#allocation1 + $0x18] sm:$0xff pattern:$0x73625140]  ;;  %v1207_v25 = vld.sshfl [vmem:[#allocation1] sm:$0xff pattern:$0x73625140]  ;;  %v1006_v44 = vsel %vm567_vm5, %v998_v30, %v954_v15 }
 0x186   : > { %1221 = vrot.lane.b32.xlu0 %v1213_v60, %s1897_s29  ;;  %v1211_v1 = vld.sshfl [vmem:[#allocation1 + $0x10] sm:$0xff pattern:$0x73625140]  ;;  %v1209_v2 = vld.sshfl [vmem:[#allocation1 + $0x8] sm:$0xff pattern:$0x73625140]  ;;  %v854_v60 = vsel %vm852_vm0, %v847_v54, %v2277_v41 }
 0x187   : > { %1219 = vrot.lane.b32.xlu2 %v1211_v1, %s1897_s29  ;;  %1227 = vst [vmem:[#allocation1] ss:$4 sm:$0xff] %v1995_v0  ;;  %v800_v1 = vsel %vm797_vm14, %v2225_v4, %v2266_v13  ;;  %v952_v54 = vrot.slane %v854_v60, 4 }
 0x188   : > { %v939_v13 = vrot.slane %v800_v1, 2 }
 0x189   : > { %v2291_v31 = vpop.permute.xlu1 %878 }
 0x18a   : > { %v885_v23 = vsel %vm882_vm1, %v2291_v31, %v881_v63  ;;  %v884_v32 = vsel %vm882_vm1, %v877_v5, %v2291_v31  ;;  %v989_v27 = vsel %vm576_vm6, %v2248_v21, %v939_v13 }
 0x18b   : > { %v920_v29 = vpop.permute.xlu2 %919  ;;  %v958_v39 = vrot.slane %v885_v23, 2 }
 0x18d   : > { %v1014_v55 = vsel %vm576_vm6, %v1004_v62, %v958_v39 }
 0x18e   : > { %1217 = vrot.lane.b32.xlu0 %v1209_v2, %s1897_s29  ;;  %v1228_v34 = vld.sshfl [vmem:[#allocation1] sm:$0xff pattern:$0x73625140] }
 0x18f   : > { %1230 = vrot.lane.b32.xlu1 %v1228_v34, %s1897_s29  ;;  %1236 = vst [vmem:[#allocation1] ss:$4 sm:$0xff] %v1995_v0  ;;  %1215 = vrot.lane.b32.xlu2 %v1207_v25, %s1897_s29  ;;  %v799_v25 = vsel %vm797_vm14, %v2242_v18, %v2225_v4  ;;  %v951_v34 = vrot.slane %v853_v47, 4  ;;  %vm1198_vm14 = vcmask 23552  }
 0x190   : > { %v938_v18 = vrot.slane %v799_v25, 2 }
 0x191   : > { %v875_v8 = vpop.permute.xlu1 %874 }
 0x192   : > { %v890_v45 = vpop.permute.xlu0 %889  ;;  %v883_v7 = vsel %vm882_vm1, %v875_v8, %v877_v5  ;;  %v994_v8 = vsel %vm555_vm4, %v2207_v43, %v947_v35  ;;  %v986_v22 = vsel %vm576_vm6, %v2245_v19, %v938_v18 }
 0x193   : > { %v894_v51 = vsel %vm882_vm1, %v881_v63, %v890_v45  ;;  %v946_v63 = vrot.slane %v823_v36, 6  ;;  %v956_v56 = vrot.slane %v883_v7, 2  ;;  %v957_v45 = vrot.slane %v884_v32, 2 }
 0x194   : > { %v959_v40 = vrot.slane %v894_v51, 2  ;;  %v1002_v43 = vsel %vm567_vm5, %v994_v8, %v952_v54  ;;  %v1901_v8 = vmov 0  }
 0x195   : > { %v992_v4 = vsel %vm555_vm4, %v2205_v42, %v946_v63  ;;  %1811 = vset.pattern.permute.xlu1 %v1901_v8  ;;  %1810 = vset.pattern.permute.xlu0 %v1901_v8 }
 0x196   : > { %v1241_v16 = vld.sshfl [vmem:[#allocation1 + $0x10] sm:$0xff pattern:$0x73625140]  ;;  %v1237_v17 = vld.sshfl [vmem:[#allocation1] sm:$0xff pattern:$0x73625140]  ;;  %v1017_v2 = vsel %vm576_vm6, %v1006_v44, %v959_v40  ;;  %v1000_v42 = vsel %vm567_vm5, %v992_v4, %v951_v34  ;;  %1812 = vset.pattern.permute.xlu2 %v1901_v8 }
 0x197   : > { %1249 = vrot.lane.b32.xlu1 %v1241_v16, %s1898_s8  ;;  %1245 = vrot.lane.b32.xlu0 %v1237_v17, %s1898_s8  ;;  %v1243_v26 = vld.sshfl [vmem:[#allocation1 + $0x18] sm:$0xff pattern:$0x73625140]  ;;  %v1239_v28 = vld.sshfl [vmem:[#allocation1 + $0x8] sm:$0xff pattern:$0x73625140]  ;;  %v1008_v17 = vsel %vm576_vm6, %v1000_v42, %v956_v56 }
 0x198   : > { %1251 = vrot.lane.b32.xlu2 %v1243_v26, %s1898_s8  ;;  %1257 = vst [vmem:[#allocation1] ss:$4 sm:$0xff] %v1995_v0  ;;  %v936_v16 = vrot.slane %v804_v9, 2  ;;  %v1011_v26 = vsel %vm576_vm6, %v1002_v43, %v957_v45  ;;  %v1487_v9 = vld [vmem:[%s2568_s4] sm:$0xff] }
 0x19a   : > { %v911_v50 = vpop.permute.xlu1 %910  ;;  %v909_v58 = vpop.permute.xlu0 %908  ;;  %v980_v19 = vsel %vm576_vm6, %v2251_v57, %v936_v16 }
 0x19b   : > { %v915_v59 = vsel %vm912_vm2, %v909_v58, %v911_v50  ;;  %v924_v48 = vsel %vm912_vm2, %v911_v50, %v920_v29 }
 0x19c   : > { %v1030_v49 = vsel %vm555_vm4, %v915_v59, 0  ;;  %v1032_v52 = vsel %vm555_vm4, %v924_v48, 0 }
 0x19d   : > { %1065 = vmatpush.bf16.msrb.mxu2 %v1030_v49  ;;  %1078 = vmatpush.bf16.msrb.mxu3 %v1032_v52 }
 0x19f   : > { %1247 = vrot.lane.b32.xlu1 %v1239_v28, %s1898_s8  ;;  %v1258_v41 = vld.sshfl [vmem:[#allocation1] sm:$0xff pattern:$0x73625140] }
 0x1a0   : > { %1260 = vrot.lane.b32.xlu0 %v1258_v41, %s1898_s8  ;;  %1266 = vst [vmem:[#allocation1] ss:$4 sm:$0xff] %v1995_v0  ;;  %v1019_v41 = vld [vmem:[%s2566_s2] sm:$0xf] }
 0x1a1   : > { %1066 = vmatpush.bf16.msrb.mxu2 %v1014_v55  ;;  %1079 = vmatpush.bf16.msrb.mxu3 %v1017_v2 }
 0x1a2   : > { %v907_v31 = vpop.permute.xlu1 %906  ;;  %v905_v5 = vpop.permute.xlu0 %904 }
 0x1a3   : > { %v913_v6 = vsel %vm912_vm2, %v905_v5, %v907_v31  ;;  %v914_v10 = vsel %vm912_vm2, %v907_v31, %v909_v58 }
 0x1a4   : > { %v1024_v12 = vsel %vm555_vm4, %v913_v6, 0  ;;  %v1027_v15 = vsel %vm555_vm4, %v914_v10, 0 }
 0x1a5   : > { %1039 = vmatpush.bf16.msrb.mxu0 %v1024_v12  ;;  %1052 = vmatpush.bf16.msrb.mxu1 %v1027_v15  ;;  %v2363_v39 = vpop.permute.xlu2 %1102 }
 0x1a6   : > { %1067 = vmatpush.bf16.msrb.mxu2 %v986_v22  ;;  %1080 = vmatpush.bf16.msrb.mxu3 %v989_v27  ;;  %v1489_v22 = vld [vmem:[%s2568_s4 + $0x10] sm:$0xff] }
 0x1a7   : > { %v1273_v23 = vld.sshfl [vmem:[#allocation1 + $0x18] sm:$0xff pattern:$0x73625140]  ;;  %v1269_v51 = vld.sshfl [vmem:[#allocation1 + $0x8] sm:$0xff pattern:$0x73625140] }
 0x1a8   : > { %1281 = vrot.lane.b32.xlu0 %v1273_v23, %s1899_s9  ;;  %v1271_v28 = vld.sshfl [vmem:[#allocation1 + $0x10] sm:$0xff pattern:$0x73625140]  ;;  %v1267_v29 = vld.sshfl [vmem:[#allocation1] sm:$0xff pattern:$0x73625140] }
 0x1a9   : > { %1279 = vrot.lane.b32.xlu2 %v1271_v28, %s1899_s9  ;;  %1287 = vst [vmem:[#allocation1] ss:$4 sm:$0xff] %v1995_v0  ;;  %1040 = vmatpush.bf16.msrb.mxu0 %v1008_v17 }
 0x1aa   : > { %1053 = vmatpush.bf16.msrb.mxu1 %v1011_v26 }
 0x1ad   : > { %1041 = vmatpush.bf16.msrb.mxu0 %v980_v19 }
 0x1ae   : > { %1054 = vmatpush.bf16.msrb.mxu1 %v2269_v33 }
 0x1b0   : > { %v1288_v21 = vld.sshfl [vmem:[#allocation1] sm:$0xff pattern:$0x73625140] }
 0x1b1   : > { %1275 = vrot.lane.b32.xlu2 %v1267_v29, %s1899_s9  ;;  %1290 = vrot.lane.b32.xlu1 %v1288_v21, %s1899_s9  ;;  %1296 = vst [vmem:[#allocation1] ss:$4 sm:$0xff] %v1995_v0 }
 0x1b6   : > { %v2367_v58 = vpop.permute.xlu2 %1132 }
 0x1b8   : > { %v1303_v11 = vld.sshfl [vmem:[#allocation1 + $0x18] sm:$0xff pattern:$0x73625140]  ;;  %v1301_v30 = vld.sshfl [vmem:[#allocation1 + $0x10] sm:$0xff pattern:$0x73625140] }
 0x1b9   : > { %1311 = vrot.lane.b32.xlu0 %v1303_v11, %s1900_s13  ;;  %1309 = vrot.lane.b32.xlu2 %v1301_v30, %s1900_s13  ;;  %v1297_v36 = vld.sshfl [vmem:[#allocation1] sm:$0xff pattern:$0x73625140]  ;;  %v1299_v38 = vld.sshfl [vmem:[#allocation1 + $0x8] sm:$0xff pattern:$0x73625140] }
 0x1ba   : > { %1305 = vrot.lane.b32.xlu1 %v1297_v36, %s1900_s13  ;;  %1317 = vst [vmem:[#allocation1] ss:$4 sm:$0xff] %v1995_v0 }
 0x1bc   : > { %v1105_v57 = vpop.permute.xlu0 %1104 }
 0x1bd   : > { %v1107_v33 = vpop.permute.xlu1 %1106  ;;  %v1110_v48 = vsel %vm1108_vm3, %v2363_v39, %v1105_v57 }
 0x1be   : > { %v1111_v40 = vsel %vm1108_vm3, %v1105_v57, %v1107_v33 }
 0x1c1   : > { %1277 = vrot.lane.b32.xlu0 %v1269_v51, %s1899_s9  ;;  %1307 = vrot.lane.b32.xlu2 %v1299_v38, %s1900_s13  ;;  %v1318_v50 = vld.sshfl [vmem:[#allocation1] sm:$0xff pattern:$0x73625140] }
 0x1c2   : > { %1320 = vrot.lane.b32.xlu1 %v1318_v50, %s1900_s13  ;;  %1341 = vst [vmem:[#allocation1] ss:$4 sm:$0xff] %v1995_v0 }
 0x1c9   : > { %1149 = vrot.lane.b32.xlu0 %v2255_v24, %s1895_s22  ;;  %1130 = vrot.lane.b32.xlu2 %v2228_v46, %s1894_s21  ;;  %v1344_v19 = vld.sshfl [vmem:[#allocation1 + $0x10] sm:$0xff pattern:$0x73625140] }
 0x1ca   : > { %1119 = vrot.lane.b32.xlu1 %v2223_v3, %s1894_s21  ;;  %v2384_v3 = vpop.permute.xlu2 %1162 }
 0x1cd   : > { %v1135_v59 = vpop.permute.xlu0 %1134 }
 0x1ce   : > { %v1140_v62 = vsel %vm1138_vm7, %v2367_v58, %v1135_v59  ;;  %v1137_v0 = vpop.permute.xlu1 %1136 }
 0x1cf   : > { %v1329_v44 = vrot.slane %v1140_v62, 6  ;;  %v1141_v63 = vsel %vm1138_vm7, %v1135_v59, %v1137_v0 }
 0x1d0   : > { %v1330_v47 = vrot.slane %v1141_v63, 6 }
 0x1d1   : > { %1100 = vrot.lane.b32.xlu0 %v2217_v61, %s1893_s20  ;;  %1089 = vrot.lane.b32.xlu2 %v2214_v53, %s1893_s20  ;;  %v2387_v46 = vsel %vm555_vm4, %v1110_v48, %v1329_v44 }
 0x1d2   : > { %1160 = vrot.lane.b32.xlu1 %v2271_v37, %s1895_s22  ;;  %v1371_v24 = vsel %vm555_vm4, %v1111_v40, %v1330_v47  ;;  %v1488_v40 = vld [vmem:[%s2568_s4 + $0x8] sm:$0xff]  ;;  %s1652_s22 = scalar_lea.hbm %s2571_s7, %s1745_s19 }
 0x1d3   : > { %s1656_s29 = sshll.u32 %s1652_s22, 4  ;;  %s1657_s29 = int_to_ptr.hbm [resolvable:$true] %s1656_s29 }
 0x1d4   : > { %s1827_s8 = sshra.s32 %s1657_s29, 4  ;;  %s1828_s8 = int_to_ptr.hbm [resolvable:$true] %s1827_s8 }
 0x1d5   : > { %s1829_s9 = scalar_lea.hbm %s1828_s8, 32  ;;  %p1834_p0 = scmp.lt.s32.totalorder %s1828_s8, %s2571_s7 }
 0x1d6   : > { %p1830_p11 = scmp.ne.s32.totalorder %s1828_s8, %s1829_s9  ;;  %p1835_p1 = scmp.lt.s32.totalorder %s1833_s15, %s1829_s9 }
 0x1d8   : > { %v2396_v61 = vpop.permute.xlu2 %1192  ;;  %p1831_p12 = pnand %p1830_p11, %p1980_p5  ;;  %p1836_p2 = por %p1835_p1, %p1834_p0 }
 0x1d9   : > { %1190 = vrot.lane.b32.xlu2 %v2284_v14, %s1896_s23  ;;  %v617_v14 = vld [vmem:[%s2565_s1] sm:$0xf]  ;;  %1502 = vperm.xlu0 %1810, %v1489_v22  }
 0x1da   : > { %1179 = vrot.lane.b32.xlu1 %v2279_v20, %s1896_s23  ;;  %1725 = vmatmul.msk.bf16.vlgmr.msra.gmra.mxu2 %vm618_vm9, %v617_v14  ;;  %s1654_s23 = sshll.u32 %s271_s18, 4  ;;  %p1832_p13 = pneg %p1831_p12  ;;  %s1655_s23 = int_to_ptr.vmem [resolvable:$true] %s1654_s23 }
 0x1db   : > { %1726 = vmatmul.msk.bf16.vlgmr.msra.gmra.mxu3 %vm618_vm9, %v617_v14  ;;  %1723 = vmatmul.msk.bf16.vlgmr.msra.gmra.mxu0 %vm618_vm9, %v617_v14 }
 0x1dc   : > { %1724 = vmatmul.msk.bf16.vlgmr.msra.gmra.mxu1 %vm618_vm9, %v617_v14  ;;  %p1837_p3 = pnand %p1836_p2, %p1832_p13 }
 0x1de   : > { %v1165_v53 = vpop.permute.xlu0 %1164 }
 0x1df   : > { %v1167_v49 = vpop.permute.xlu1 %1166  ;;  %v1170_v27 = vsel %vm1168_vm8, %v2384_v3, %v1165_v53 }
 0x1e0   : > { %v1171_v52 = vsel %vm1168_vm8, %v1165_v53, %v1167_v49  ;;  %v1334_v57 = vrot.slane %v1170_v27, 4  ;;  %v1342_v53 = vld.sshfl [vmem:[#allocation1] sm:$0xff pattern:$0x73625140] }
 0x1e1   : > { %v1335_v35 = vrot.slane %v1171_v52, 4  ;;  %v1220_v37 = vpop.permute.xlu2 %1219  ;;  %1497 = vperm.xlu2 %1812, %v1488_v40   ;;  %v1343_v49 = vld.sshfl [vmem:[#allocation1 + $0x8] sm:$0xff pattern:$0x73625140] }
 0x1e2   : > { %1492 = vperm.xlu1 %1811, %v1487_v9  }
 0x1e3   : > { %v2400_v60 = vsel %vm567_vm5, %v1371_v24, %v1335_v35 }
 0x1e9   : > { %v1216_v25 = vpop.permute.xlu2 %1215 }
 0x1ea   : > { %1729 = vmatmul.msk.bf16.vlgmr.msrb.gmra.mxu2 %vm618_vm9, %v1019_v41 }
 0x1eb   : > { %1730 = vmatmul.msk.bf16.vlgmr.msrb.gmra.mxu3 %vm618_vm9, %v1019_v41  ;;  %1727 = vmatmul.msk.bf16.vlgmr.msrb.gmra.mxu0 %vm618_vm9, %v1019_v41 }
 0x1ec   : > { %1728 = vmatmul.msk.bf16.vlgmr.msrb.gmra.mxu1 %vm618_vm9, %v1019_v41 }
 0x1ef   : > { %v2415_v2 = vpop.permute.xlu1 %1196 }
 0x1f0   : > { %v2402_v1 = vpop.permute.xlu0 %1194 }
 0x1f1   : > { %v1200_v23 = vsel %vm1198_vm14, %v2396_v61, %v2402_v1 }
 0x1f2   : > { %v2411_v20 = vpop.permute.xlu2 %1251  ;;  %v1339_v50 = vrot.slane %v1200_v23, 2 }
 0x1f8   : > { %v2413_v55 = vpop.permute.xlu0 %1221 }
 0x1f9   : > { %v1226_v12 = vsel %vm1223_vm11, %v1220_v37, %v2413_v55 }
 0x1fa   : > { %v1349_v16 = vrot.slane %v1226_v12, 6 }
 0x1fc   : > { %v1397_v62 = vsel %vm555_vm4, %v1344_v19, %v1349_v16 }
 0x200   : > { %v1218_v7 = vpop.permute.xlu0 %1217 }
 0x201   : > { %v1231_v54 = vpop.permute.xlu1 %1230  ;;  %v1224_v51 = vsel %vm1223_vm11, %v1216_v25, %v1218_v7  ;;  %v1225_v21 = vsel %vm1223_vm11, %v1218_v7, %v1220_v37  ;;  %v1377_v25 = vsel %vm567_vm5, %v2387_v46, %v1334_v57  ;;  %v1562_v46 = vld [vmem:[%s2570_s6] sm:$0xff] }
 0x202   : > { %v1347_v0 = vrot.slane %v1224_v51, 6  ;;  %v1348_v44 = vrot.slane %v1225_v21, 6  ;;  %v1235_v63 = vsel %vm1223_vm11, %v2413_v55, %v1231_v54  ;;  %v1387_v55 = vsel %vm576_vm6, %v1377_v25, %v1339_v50  ;;  %1565 = vperm.xlu1 %1811, %v1562_v46  }
 0x203   : > { %v2417_v34 = vpop.permute.xlu2 %1279  ;;  %v1350_v14 = vrot.slane %v1235_v63, 6 }
 0x209   : > { %v1246_v4 = vpop.permute.xlu0 %1245  ;;  %v1250_v18 = vpop.permute.xlu1 %1249 }
 0x20a   : > { %v1256_v15 = vsel %vm1253_vm12, %v1250_v18, %v2411_v20 }
 0x20b   : > { %v2426_v32 = vpop.permute.xlu2 %1275  ;;  %v1354_v26 = vrot.slane %v1256_v15, 4 }
 0x20d   : > { %v1405_v47 = vsel %vm567_vm5, %v1397_v62, %v1354_v26 }
 0x211   : > { %v1248_v31 = vpop.permute.xlu1 %1247 }
 0x212   : > { %v1261_v56 = vpop.permute.xlu0 %1260  ;;  %v1254_v59 = vsel %vm1253_vm12, %v1246_v4, %v1248_v31  ;;  %v1255_v48 = vsel %vm1253_vm12, %v1248_v31, %v1250_v18 }
 0x213   : > { %v1310_v13 = vpop.permute.xlu2 %1309  ;;  %v1352_v52 = vrot.slane %v1254_v59, 4  ;;  %v1353_v35 = vrot.slane %v1255_v48, 4  ;;  %v1265_v37 = vsel %vm1253_vm12, %v2411_v20, %v1261_v56  ;;  %v1395_v20 = vsel %vm555_vm4, %v1343_v49, %v1348_v44 }
 0x214   : > { %v1355_v8 = vrot.slane %v1265_v37, 4 }
 0x21a   : > { %v1282_v10 = vpop.permute.xlu0 %1281 }
 0x21b   : > { %v1308_v5 = vpop.permute.xlu2 %1307  ;;  %v1286_v43 = vsel %vm1283_vm13, %v2417_v34, %v1282_v10 }
 0x21c   : > { %v1315_v45 = vsel %vm1313_vm10, %v1308_v5, %v1310_v13  ;;  %v1359_v11 = vrot.slane %v1286_v43, 2 }
 0x21d   : > { %v1428_v6 = vsel %vm555_vm4, %v1315_v45, 0 }
 0x21e   : > { %1453 = vmatpush.bf16.msra.mxu1 %v1428_v6  ;;  %v1415_v24 = vsel %vm576_vm6, %v1405_v47, %v1359_v11  ;;  %v1403_v6 = vsel %vm567_vm5, %v1395_v20, %v1353_v35 }
 0x223   : > { %v1291_v42 = vpop.permute.xlu1 %1290  ;;  %v2450_v30 = vpop.permute.xlu2 %1130 }
 0x224   : > { %v1295_v7 = vsel %vm1283_vm13, %v1282_v10, %v1291_v42  ;;  %v1420_v10 = vld [vmem:[%s2567_s3] sm:$0xf]  ;;  %v1201_v42 = vsel %vm1198_vm14, %v2402_v1, %v2415_v2  ;;  %v1139_v51 = vsel %vm1138_vm7, %v2450_v30, %v2367_v58 }
 0x225   : > { %v1340_v16 = vrot.slane %v1201_v42, 2 }
 0x227   : > { %v1390_v2 = vsel %vm576_vm6, %v2400_v60, %v1340_v16 }
 0x22b   : > { %v1312_v17 = vpop.permute.xlu0 %1311  ;;  %v1090_v12 = vpop.permute.xlu2 %1089 }
 0x22c   : > { %v1316_v28 = vsel %vm1313_vm10, %v1310_v13, %v1312_v17  ;;  %v1306_v29 = vpop.permute.xlu1 %1305  ;;  %v1393_v13 = vsel %vm555_vm4, %v1342_v53, %v1347_v0 }
 0x22d   : > { %v1431_v36 = vsel %vm555_vm4, %v1316_v28, 0  ;;  %v1314_v38 = vsel %vm1313_vm10, %v1306_v29, %v1308_v5  ;;  %v1345_v5 = vld.sshfl [vmem:[#allocation1 + $0x18] sm:$0xff pattern:$0x73625140]  ;;  %v1328_v28 = vrot.slane %v1139_v51, 6 }
 0x22e   : > { %v1425_v33 = vsel %vm555_vm4, %v1314_v38, 0  ;;  %1466 = vmatpush.bf16.msra.mxu2 %v1431_v36  ;;  %v1399_v22 = vsel %vm555_vm4, %v1345_v5, %v1350_v14 }
 0x22f   : > { %1440 = vmatpush.bf16.msra.mxu0 %v1425_v33  ;;  %v1407_v27 = vsel %vm567_vm5, %v1399_v22, %v1355_v8 }
 0x232   : > { %1467 = vmatpush.bf16.msra.mxu2 %v1415_v24 }
 0x233   : > { %v1278_v41 = vpop.permute.xlu0 %1277  ;;  %v1191_v26 = vpop.permute.xlu2 %1190 }
 0x234   : > { %v1284_v54 = vsel %vm1283_vm13, %v2426_v32, %v1278_v41  ;;  %v1285_v4 = vsel %vm1283_vm13, %v1278_v41, %v2417_v34  ;;  %v1321_v18 = vpop.permute.xlu1 %1320  ;;  %v1360_v32 = vrot.slane %v1295_v7, 2  ;;  %v1401_v34 = vsel %vm567_vm5, %v1393_v13, %v1352_v52 }
 0x235   : > { %v1357_v9 = vrot.slane %v1284_v54, 2  ;;  %v1358_v56 = vrot.slane %v1285_v4, 2  ;;  %v1325_v31 = vsel %vm1313_vm10, %v1312_v17, %v1321_v18  ;;  %v1199_v19 = vsel %vm1198_vm14, %v1191_v26, %v2396_v61 }
 0x236   : > { %v1433_v45 = vsel %vm555_vm4, %v1325_v31, 0  ;;  %1468 = vmatpush.bf16.msra.mxu2 %v1387_v55  ;;  %v1418_v17 = vsel %vm576_vm6, %v1407_v27, %v1360_v32  ;;  %v1338_v57 = vrot.slane %v1199_v19, 2  ;;  %vm1568_vm10 = vcmask 195584  }
 0x237   : > { %1479 = vmatpush.bf16.msra.mxu3 %v1433_v45  ;;  %v1409_v15 = vsel %vm576_vm6, %v1401_v34, %v1357_v9  ;;  %v1412_v43 = vsel %vm576_vm6, %v1403_v6, %v1358_v56 }
 0x238   : > { %1441 = vmatpush.bf16.msra.mxu0 %v1409_v15  ;;  %1454 = vmatpush.bf16.msra.mxu1 %v1412_v43 }
 0x239   : > { %1733 = vmatmul.msk.bf16.vlgmr.msra.gmra.mxu2 %vm618_vm9, %v1420_v10 }
 0x23b   : > { %1480 = vmatpush.bf16.msra.mxu3 %v1418_v17  ;;  %v1150_v23 = vpop.permute.xlu0 %1149  ;;  %v1498_v55 = vpop.permute.xlu2 %1497 }
 0x23c   : > { %v1120_v1 = vpop.permute.xlu1 %1119 }
 0x23d   : > { %v1145_v58 = vsel %vm1138_vm7, %v1120_v1, %v2450_v30 }
 0x23f   : > { %1481 = vmatpush.bf16.msra.mxu3 %v1390_v2 }
 0x242   : > { %1734 = vmatmul.msk.bf16.vlgmr.msra.gmra.mxu3 %vm618_vm9, %v1420_v10 }
 0x243   : > { %v1101_v29 = vpop.permute.xlu0 %1100 }
 0x244   : > { %v1109_v21 = vsel %vm1108_vm3, %v1101_v29, %v2363_v39  ;;  %v1161_v11 = vpop.permute.xlu1 %1160  ;;  %v1115_v61 = vsel %vm1108_vm3, %v1090_v12, %v1101_v29  ;;  %v1327_v39 = vrot.slane %v1145_v58, 6 }
 0x245   : > { %v1365_v36 = vsel %vm555_vm4, %v1109_v21, %v1328_v28  ;;  %v1169_v60 = vsel %vm1168_vm8, %v1161_v11, %v2384_v3  ;;  %v1175_v33 = vsel %vm1168_vm8, %v1150_v23, %v1161_v11 }
 0x246   : > { %v1333_v38 = vrot.slane %v1169_v60, 4  ;;  %v1332_v59 = vrot.slane %v1175_v33, 4  ;;  %v1362_v48 = vsel %vm555_vm4, %v1115_v61, %v1327_v39 }
 0x248   : > { %v1375_v40 = vsel %vm567_vm5, %v1365_v36, %v1333_v38  ;;  %v1373_v30 = vsel %vm567_vm5, %v1362_v48, %v1332_v59  ;;  %v1553_v59 = vld [vmem:[%s2569_s5] sm:$0xf] }
 0x249   : > { %v1384_v50 = vsel %vm576_vm6, %v1375_v40, %v1338_v57 }
 0x24a   : > { %1455 = vmatpush.bf16.msra.mxu1 %v1384_v50 }
 0x24b   : > { %v1503_v2 = vpop.permute.xlu0 %1502 }
 0x24c   : > { %v1180_v62 = vpop.permute.xlu1 %1179 }
 0x24d   : > { %v1205_v3 = vsel %vm1198_vm14, %v1180_v62, %v1191_v26  ;;  %1732 = vmatmul.msk.bf16.vlgmr.msra.gmra.mxu1 %vm618_vm9, %v1420_v10 }
 0x24e   : > { %v1337_v0 = vrot.slane %v1205_v3, 2 }
 0x250   : > { %v1381_v44 = vsel %vm576_vm6, %v1373_v30, %v1337_v0 }
 0x251   : > { %1442 = vmatpush.bf16.msra.mxu0 %v1381_v44 }
 0x254   : > { %1731 = vmatmul.msk.bf16.vlgmr.msra.gmra.mxu0 %vm618_vm9, %v1420_v10  ;;  %v1493_v54 = vpop.permute.xlu1 %1492 }
 0x258   : > { %v642_v63 = vpop.f32.mrf.mxu0 }
 0x259   : > { %v655_v47 = vpop.f32.mrf.mxu1  ;;  %v1505_v56 = vadd.f32 %v1493_v54, %v642_v63 }
 0x25a   : > { %v1506_v31 = vadd.f32 %v1493_v54, %v655_v47 }
 0x25b   : > { %v1529_v15 = vmul.f32 0.2, %v1505_v56  ;;  %vm1517_vm2 = vcmp.ge.f32.partialorder %v1505_v56, 0.0 }
 0x25c   : > { %v1530_v12 = vmul.f32 0.2, %v1506_v31  ;;  %vm1518_vm1 = vcmp.ge.f32.partialorder %v1506_v31, 0.0 }
 0x25d   : > { %v668_v24 = vpop.f32.mrf.mxu2  ;;  %v1541_v16 = vsel %vm1517_vm2, %v1505_v56, %v1529_v15 }
 0x25e   : > { %v681_v53 = vpop.f32.mrf.mxu3  ;;  %v1542_v22 = vsel %vm1518_vm1, %v1506_v31, %v1530_v12  ;;  %v1507_v26 = vadd.f32 %v1493_v54, %v668_v24 }
 0x25f   : > { %v1508_v18 = vadd.f32 %v1493_v54, %v681_v53 }
 0x260   : > { %v644_v49 = vpop.f32.mrf.mxu0  ;;  %v1531_v11 = vmul.f32 0.2, %v1507_v26  ;;  %vm1519_vm7 = vcmp.ge.f32.partialorder %v1507_v26, 0.0 }
 0x261   : > { %v657_v52 = vpop.f32.mrf.mxu1  ;;  %vm1520_vm6 = vcmp.ge.f32.partialorder %v1508_v18, 0.0  ;;  %v1532_v45 = vmul.f32 0.2, %v1508_v18 }
 0x262   : > { %v1543_v57 = vsel %vm1519_vm7, %v1507_v26, %v1531_v11 }
 0x263   : > { %v1544_v42 = vsel %vm1520_vm6, %v1508_v18, %v1532_v45 }
 0x265   : > { %v670_v35 = vpop.f32.mrf.mxu2 }
 0x266   : > { %v683_v37 = vpop.f32.mrf.mxu3 }
 0x268   : > { %v1043_v25 = vpop.f32.mrf.mxu0 }
 0x269   : > { %v1056_v14 = vpop.f32.mrf.mxu1  ;;  %v1509_v13 = vadd.f32 %v1498_v55, %v1043_v25 }
 0x26a   : > { %v1510_v20 = vadd.f32 %v1498_v55, %v1056_v14 }
 0x26b   : > { %v1533_v5 = vmul.f32 0.2, %v1509_v13  ;;  %vm1521_vm15 = vcmp.ge.f32.partialorder %v1509_v13, 0.0 }
 0x26c   : > { %v1534_v32 = vmul.f32 0.2, %v1510_v20  ;;  %vm1522_vm0 = vcmp.ge.f32.partialorder %v1510_v20, 0.0 }
 0x26d   : > { %v1069_v7 = vpop.f32.mrf.mxu2  ;;  %v1545_v17 = vsel %vm1521_vm15, %v1509_v13, %v1533_v5 }
 0x26e   : > { %v1082_v41 = vpop.f32.mrf.mxu3  ;;  %v1546_v27 = vsel %vm1522_vm0, %v1510_v20, %v1534_v32  ;;  %v1554_v1 = vpack.c.bf16 %v1545_v17, %v1541_v16  ;;  %v1511_v51 = vadd.f32 %v1498_v55, %v1069_v7 }
 0x26f   : > { %v1512_v4 = vadd.f32 %v1498_v55, %v1082_v41  ;;  %v1555_v23 = vpack.c.bf16 %v1546_v27, %v1542_v22 }
 0x270   : > { %v1045_v46 = vpop.f32.mrf.mxu0  ;;  %v1535_v21 = vmul.f32 0.2, %v1511_v51  ;;  %vm1523_vm8 = vcmp.ge.f32.partialorder %v1511_v51, 0.0 }
 0x271   : > { %v1058_v8 = vpop.f32.mrf.mxu1  ;;  %v1536_v9 = vmul.f32 0.2, %v1512_v4  ;;  %vm1524_vm4 = vcmp.ge.f32.partialorder %v1512_v4, 0.0 }
 0x272   : > { %v1547_v58 = vsel %vm1523_vm8, %v1511_v51, %v1535_v21 }
 0x273   : > { %v1548_v34 = vsel %vm1524_vm4, %v1512_v4, %v1536_v9  ;;  %v1556_v50 = vpack.c.bf16 %v1547_v58, %v1543_v57 }
 0x274   : > { %v1557_v43 = vpack.c.bf16 %v1548_v34, %v1544_v42  ;;  %v1566_v55 = vpop.permute.xlu1 %1565 }
 0x275   : > { %v1071_v6 = vpop.f32.mrf.mxu2 }
 0x276   : > { %v1084_v10 = vpop.f32.mrf.mxu3 }
 0x2bc   : > { %v1470_v28 = vpop.f32.mrf.mxu2 }
 0x2bd   : > { %v1515_v29 = vadd.f32 %v1503_v2, %v1470_v28 }
 0x2bf   : > { %vm1527_vm3 = vcmp.ge.f32.partialorder %v1515_v29, 0.0  ;;  %v1539_v19 = vmul.f32 0.2, %v1515_v29 }
 0x2c1   : > { %v1551_v36 = vsel %vm1527_vm3, %v1515_v29, %v1539_v19 }
 0x2c2   : > { %v1560_v60 = vpack.c.bf16 %v1551_v36, %v1551_v36 }
 0x2c4   : > { %v1579_v38 = vsel %vm567_vm5, %v1560_v60, 0  ;;  %v1472_v33 = vpop.f32.mrf.mxu2 }
 0x2c5   : > { %v1483_v40 = vpop.f32.mrf.mxu3  ;;  %1616 = vmatpush.bf16.msrb.mxu2 %v1579_v38 }
 0x2c6   : > { %v1516_v61 = vadd.f32 %v1503_v2, %v1483_v40 }
 0x2c8   : > { %vm1528_vm9 = vcmp.ge.f32.partialorder %v1516_v61, 0.0  ;;  %v1540_v39 = vmul.f32 0.2, %v1516_v61 }
 0x2c9   : > { %1617 = vmatpush.bf16.msrb.mxu2 %v1556_v50 }
 0x2ca   : > { %v1552_v48 = vsel %vm1528_vm9, %v1516_v61, %v1540_v39  ;;  %v1457_v62 = vpop.f32.mrf.mxu1 }
 0x2cb   : > { %v1561_v3 = vpack.c.bf16 %v1552_v48, %v1552_v48  ;;  %v1514_v0 = vadd.f32 %v1503_v2, %v1457_v62 }
 0x2cc   : > { %1737 = vmatmul.msk.bf16.vlgmr.msrb.gmra.mxu2 %vm1568_vm10, %v1553_v59 }
 0x2cd   : > { %vm1526_vm11 = vcmp.ge.f32.partialorder %v1514_v0, 0.0  ;;  %v1538_v30 = vmul.f32 0.2, %v1514_v0  ;;  %v1485_v44 = vpop.f32.mrf.mxu3  ;;  %v1582_v63 = vsel %vm567_vm5, %v1561_v3, 0 }
 0x2ce   : > { %1629 = vmatpush.bf16.msrb.mxu3 %v1582_v63 }
 0x2cf   : > { %v1550_v47 = vsel %vm1526_vm11, %v1514_v0, %v1538_v30 }
 0x2d0   : > { %v1559_v24 = vpack.c.bf16 %v1550_v47, %v1550_v47 }
 0x2d1   : > { %v1444_v53 = vpop.f32.mrf.mxu0 }
 0x2d2   : > { %v1513_v49 = vadd.f32 %v1503_v2, %v1444_v53  ;;  %v1459_v52 = vpop.f32.mrf.mxu1  ;;  %1630 = vmatpush.bf16.msrb.mxu3 %v1557_v43  ;;  %v1576_v35 = vsel %vm567_vm5, %v1559_v24, 0 }
 0x2d3   : > { %1603 = vmatpush.bf16.msrb.mxu1 %v1576_v35 }
 0x2d4   : > { %vm1525_vm12 = vcmp.ge.f32.partialorder %v1513_v49, 0.0  ;;  %v1537_v37 = vmul.f32 0.2, %v1513_v49 }
 0x2d5   : > { %1738 = vmatmul.msk.bf16.vlgmr.msrb.gmra.mxu3 %vm1568_vm10, %v1553_v59 }
 0x2d6   : > { %v1549_v25 = vsel %vm1525_vm12, %v1513_v49, %v1537_v37 }
 0x2d7   : > { %v1558_v14 = vpack.c.bf16 %v1549_v25, %v1549_v25  ;;  %1604 = vmatpush.bf16.msrb.mxu1 %v1555_v23 }
 0x2d9   : > { %v1446_v7 = vpop.f32.mrf.mxu0  ;;  %v1573_v41 = vsel %vm567_vm5, %v1558_v14, 0 }
 0x2da   : > { %1590 = vmatpush.bf16.msrb.mxu0 %v1573_v41  ;;  %1736 = vmatmul.msk.bf16.vlgmr.msrb.gmra.mxu1 %vm1568_vm10, %v1553_v59 }
 0x2de   : > { %1591 = vmatpush.bf16.msrb.mxu0 %v1554_v1 }
 0x2e1   : > { %1735 = vmatmul.msk.bf16.vlgmr.msrb.gmra.mxu0 %vm1568_vm10, %v1553_v59 }
 0x34f   : > { %v1619_v54 = vpop.f32.mrf.mxu2 }
 0x350   : > { %v1620_v4 = vadd.f32 %v1619_v54, %v1566_v55 }
 0x352   : > { %1638 = vst [vmem:[%s271_s18 + $0x10] sm:$0xff] %v1620_v4 }
 0x357   : > { %v1606_v18 = vpop.f32.mrf.mxu1  ;;  %v1621_v13 = vpop.f32.mrf.mxu2 }
 0x358   : > { %v1607_v20 = vadd.f32 %v1606_v18, %v1566_v55  ;;  %v1632_v46 = vpop.f32.mrf.mxu3 }
 0x359   : > { %v1633_v8 = vadd.f32 %v1632_v46, %v1566_v55 }
 0x35a   : > { %1637 = vst [vmem:[%s271_s18 + $0x8] sm:$0xff] %v1607_v20 }
 0x35b   : > { %1639 = vst [vmem:[%s271_s18 + $0x18] sm:$0xff] %v1633_v8 }
 0x35e   : > { %v1593_v9 = vpop.f32.mrf.mxu0 }
 0x35f   : > { %v1594_v56 = vadd.f32 %v1593_v9, %v1566_v55  ;;  %v1608_v31 = vpop.f32.mrf.mxu1 }
 0x360   : > { %v1634_v5 = vpop.f32.mrf.mxu3 }
 0x361   : > { %1636 = vst [vmem:[%s271_s18] sm:$0xff] %v1594_v56 }
 0x362   : > { %1840 = shalt.err (!%p1837_p3)
}
 0x363   : > { %1746 = dma.vmem_to_hbm [thread:$0]  (%p1980_p5), %s1655_s23, 512, %s1657_s29, %s1641_s28  }
 0x366   : > { %v1595_v32 = vpop.f32.mrf.mxu0 }
 0x367 PF: > { %p1752_p4 = scmp.ge.s32.totalorder %s1875_s27, 2  ;;  %s1668_s16 = sand.u32 1, %s1863_s24  }
 0x368   : > { %s1669_s18 = scalar_lea.sflag [#allocation3], %s1668_s16 }
 0x369   : > { %p1749_p7 = pnand %p1752_p4, %p1984_p6 }
 0x36b   : > { %p1750_p8 = pneg %p1749_p7 }
 0x36d   : > { %1858 = dma.done.wait (%p1750_p8), %s1669_s18, 512  }
 0x36e   : > { %1860 = vsyncadd (%p1750_p8), %s1669_s18, 4294966784  ;;  %p17_p9 = scmp.ge.s32.totalorder %s1967_s30, 4   ;;  %s2574_s24 = smov %s1867_s25 }
 0x36f   : > { %s2575_s25 = smov %s1871_s26  ;;  %s2576_s26 = smov %s1978_s10 }
 0x370   : > { %s2577_s27 = smov %s1967_s30  ;;  %19 = sbr.rel (!%p17_p9) target bundleno = 3 (0x3), region = 83 }
 0x375   :  { %1675 = vsyncpa [#allocation3], 1 }
 0x376   :  { %1677 = vsyncpa [#allocation3 + $0x1], 1 }

</bundles_post_ra>
